<compile_context>
chip_gen: v5e
topology: v5e:2x2
jax: 0.10.0
libtpu: 0.0.40
codegen_flags: <defaults>
</compile_context>

<pallas_src>
import functools
import itertools

import jax
import jax.numpy as jnp
from jax.experimental import pallas as pl
from jax.experimental.pallas import tpu as pltpu

EPS = 1e-5  # torch.nn.LayerNorm default eps


def _layernorm(x, g, b):
    mu = jnp.mean(x, axis=-1, keepdims=True)
    var = jnp.mean((x - mu) ** 2, axis=-1, keepdims=True)  # biased, like torch
    return (x - mu) * jax.lax.rsqrt(var + EPS) * g + b


def _nbytes(a):
    return int(a.size) * a.dtype.itemsize


def _device_vmem_bytes():
    try:
        return int(pltpu.get_tpu_info().vmem_capacity_bytes)
    except Exception:
        return 64 << 20  # conservative fallback (v7x per-TC VMEM)


def _vmem_limit_bytes(working_set_bytes):
    cap = int(0.85 * _device_vmem_bytes())          # never oversubscribe device VMEM
    want = 2 * working_set_bytes + (8 << 20)        # double-buffered operands + headroom
    return int(min(max(want, 32 << 20), cap))


def _pick_tile(dim, candidates=(1024, 512, 256)):
    # Prefer 256-multiples (v6e/v7x MXU is 2x256^2); otherwise use the full extent.
    for c in candidates:
        if dim % c == 0:
            return c
    return dim


# ---------------------------------------------------------------------------
# Fused transformer-stack kernel: grid = (batch, layer).
#   - per-layer weights are streamed along the layer axis (double-buffered =>
#     next-layer weights prefetch while this layer computes),
#   - the residual stream lives in the VMEM-resident output block across layers.
# ---------------------------------------------------------------------------
_BLOCK_WEIGHT_NAMES = ("wq", "bq", "wk", "bk", "wv", "bv", "wo", "bo",
                       "g1", "b1", "wf1", "bf1", "wf2", "bf2", "g2", "b2")


def _blocks_kernel(n_head,
                   x_ref,
                   wq_ref, bq_ref, wk_ref, bk_ref, wv_ref, bv_ref,
                   wo_ref, bo_ref, g1_ref, b1_ref,
                   wf1_ref, bf1_ref, wf2_ref, bf2_ref, g2_ref, b2_ref,
                   o_ref):
    l = pl.program_id(1)

    # Layer 0: seed the VMEM-resident residual stream from the embeddings.
    @pl.when(l == 0)
    def _():
        o_ref[...] = x_ref[...]

    x = o_ref[0]                            # (T, E) f32 residual, resident across layers
    T, E = x.shape
    H = n_head
    Dh = E // H
    scale = 1.0 / (Dh ** 0.5)

    xb = x.astype(jnp.bfloat16)

    # Q/K/V projections (once per layer & batch): bf16 x bf16 -> f32 on the MXU.
    q = jnp.dot(xb, wq_ref[0], preferred_element_type=jnp.float32) + bq_ref[0]
    k = jnp.dot(xb, wk_ref[0], preferred_element_type=jnp.float32) + bk_ref[0]
    v = jnp.dot(xb, wv_ref[0], preferred_element_type=jnp.float32) + bv_ref[0]

    # Head-major (H, T, Dh); 1/sqrt(Dh) folded into q before the score dot.
    qh = jnp.transpose((q * scale).reshape(T, H, Dh), (1, 0, 2)).astype(jnp.bfloat16)
    kh = jnp.transpose(k.reshape(T, H, Dh), (1, 0, 2)).astype(jnp.bfloat16)
    vh = jnp.transpose(v.reshape(T, H, Dh), (1, 0, 2)).astype(jnp.bfloat16)

    # Head-batched attention over the full (VMEM-resident) sequence.
    # TODO(synk): flash-style K-tile streaming with an online-softmax accumulator
    # for long T where the (H, T, T) f32 score tensor would not fit VMEM (v7x 64 MiB).
    s = jnp.einsum("hqd,hkd->hqk", qh, kh, preferred_element_type=jnp.float32)
    s = s - jnp.max(s, axis=-1, keepdims=True)
    p = jnp.exp(s)
    p = p * pl.reciprocal(jnp.sum(p, axis=-1, keepdims=True), approx=True)
    ctx = jnp.einsum("hqk,hkd->hqd", p.astype(jnp.bfloat16), vh,
                     preferred_element_type=jnp.float32)
    attn = jnp.transpose(ctx, (1, 0, 2)).reshape(T, E)

    attn_out = jnp.dot(attn.astype(jnp.bfloat16), wo_ref[0],
                       preferred_element_type=jnp.float32) + bo_ref[0]

    # residual + LayerNorm 1
    x1 = _layernorm(x + attn_out, g1_ref[0], b1_ref[0])

    # MLP: Linear(E -> 4E) -> ReLU -> Linear(4E -> E)
    h1 = jnp.maximum(
        jnp.dot(x1.astype(jnp.bfloat16), wf1_ref[0],
                preferred_element_type=jnp.float32) + bf1_ref[0], 0.0)
    ff = jnp.dot(h1.astype(jnp.bfloat16), wf2_ref[0],
                 preferred_element_type=jnp.float32) + bf2_ref[0]

    # residual + LayerNorm 2 -> new resident residual (input of the next layer)
    o_ref[0] = _layernorm(x1 + ff, g2_ref[0], b2_ref[0])


def blocks_forward(x, blocks, n_head):
    """All transformer layers in a single pallas_call, grid = (batch, layer)."""
    B, T, E = x.shape
    weights = [blocks[k] for k in _BLOCK_WEIGHT_NAMES]
    L = weights[0].shape[0]

    def wspec(arr):
        nd = arr.ndim
        return pl.BlockSpec((1,) + arr.shape[1:],
                            lambda b, l, _nd=nd: (l,) + (0,) * (_nd - 1))

    # Working-set estimate: one layer's weight slice + residual blocks + f32
    # activations + the (H, T, T) score/prob tensors.
    w_bytes = sum(_nbytes(w) // L for w in weights)
    act_bytes = 4 * (2 * T * E        # resident residual + x-in block
                     + 3 * T * E      # q, k, v (f32)
                     + 4 * T * E      # MLP hidden (f32)
                     + 2 * T * E)     # attn / x1 temporaries
    score_bytes = 2 * n_head * T * T * 4
    ws = w_bytes + act_bytes + score_bytes

    # NOTE: with B == 1 only one parallel grid step exists; on v7x (2 TCs) that
    # leaves one core idle for the block stack — acceptable for this small demo.
    in_specs = ([pl.BlockSpec((1, T, E), lambda b, l: (b, 0, 0))]
                + [wspec(w) for w in weights])

    return pl.pallas_call(
        functools.partial(_blocks_kernel, n_head),
        out_shape=jax.ShapeDtypeStruct((B, T, E), jnp.float32),
        grid=(B, L),
        in_specs=in_specs,
        out_specs=pl.BlockSpec((1, T, E), lambda b, l: (b, 0, 0)),
        compiler_params=pltpu.CompilerParams(
            dimension_semantics=("parallel", "arbitrary"),
            vmem_limit_bytes=_vmem_limit_bytes(ws)),
    )(x, *weights)


# ---------------------------------------------------------------------------
# Final LayerNorm + LM head: grid = (token-tile, vocab-tile), tokens flattened
# so the head weight streams once per token tile (not once per batch element).
# ---------------------------------------------------------------------------
def _head_kernel(x_ref, g_ref, b_ref, wh_ref, bh_ref, o_ref):
    xn = _layernorm(x_ref[...], g_ref[...], b_ref[...])   # recomputed per V-tile (cheap)
    o_ref[...] = jnp.dot(xn.astype(jnp.bfloat16), wh_ref[...],
                         preferred_element_type=jnp.float32) + bh_ref[...]


def head_forward(x, params, tn=None, tv=None):
    B, T, E = x.shape
    V = params["whead"].shape[1]
    N = B * T
    xf = x.reshape(N, E)

    tn = _pick_tile(N) if tn is None else tn
    tv = _pick_tile(V) if tv is None else tv
    nt, nv = N // tn, V // tv

    ws = (tn * E * 4            # x tile
          + E * tv * 2          # bf16 head-weight tile
          + 2 * tn * tv * 4     # f32 output tile + intermediate
          + tv * 4 + 2 * E * 4)

    out = pl.pallas_call(
        _head_kernel,
        out_shape=jax.ShapeDtypeStruct((N, V), jnp.float32),
        grid=(nt, nv),
        in_specs=[
            pl.BlockSpec((tn, E), lambda ti, vi: (ti, 0)),
            pl.BlockSpec((1, E), lambda ti, vi: (0, 0)),
            pl.BlockSpec((1, E), lambda ti, vi: (0, 0)),
            pl.BlockSpec((E, tv), lambda ti, vi: (0, vi)),
            pl.BlockSpec((1, tv), lambda ti, vi: (0, vi)),
        ],
        out_specs=pl.BlockSpec((tn, tv), lambda ti, vi: (ti, vi)),
        compiler_params=pltpu.CompilerParams(
            dimension_semantics=("parallel", "parallel"),
            vmem_limit_bytes=_vmem_limit_bytes(ws)),
    )(xf, params["lnf_g"], params["lnf_b"], params["whead"], params["bhead"])
    return out.reshape(B, T, V)


# ---------------------------------------------------------------------------
# Parameters (per-layer weights stacked on a leading L axis) & full forward.
# ---------------------------------------------------------------------------
def init_params(key, vocab_size, block_size, n_embd, n_head, n_layer):
    counter = itertools.count()

    def nk():
        return jax.random.fold_in(key, next(counter))

    def nrm(shape, dtype=jnp.float32, s=0.02):
        return (s * jax.random.normal(nk(), shape, jnp.float32)).astype(dtype)

    E, L = n_embd, n_layer
    return dict(
        wte=nrm((vocab_size, E)),
        wpe=nrm((block_size, E)),
        lnf_g=1.0 + nrm((1, E)),
        lnf_b=nrm((1, E)),
        whead=nrm((E, vocab_size), jnp.bfloat16),
        bhead=nrm((1, vocab_size)),
        blocks=dict(
            wq=nrm((L, E, E), jnp.bfloat16), bq=nrm((L, 1, E)),
            wk=nrm((L, E, E), jnp.bfloat16), bk=nrm((L, 1, E)),
            wv=nrm((L, E, E), jnp.bfloat16), bv=nrm((L, 1, E)),
            wo=nrm((L, E, E), jnp.bfloat16), bo=nrm((L, 1, E)),
            g1=1.0 + nrm((L, 1, E)),         b1=nrm((L, 1, E)),
            wf1=nrm((L, E, 4 * E), jnp.bfloat16), bf1=nrm((L, 1, 4 * E)),
            wf2=nrm((L, 4 * E, E), jnp.bfloat16), bf2=nrm((L, 1, E)),
            g2=1.0 + nrm((L, 1, E)),         b2=nrm((L, 1, E)),
        ),
    )


def gpt_forward(params, idx, n_head):
    B, T = idx.shape
    # TODO(synk): token/position embedding gathers kept as plain-JAX glue (jnp.take);
    # a scalar-prefetch Pallas gather kernel is possible but not worthwhile here.
    tok = jnp.take(params["wte"], idx, axis=0)        # (B, T, E)
    pos = params["wpe"][:T][None]                     # (1, T, E)
    x = (tok + pos).astype(jnp.float32)
    x = blocks_forward(x, params["blocks"], n_head)   # all layers, one pallas_call
    return head_forward(x, params)                    # final LN + LM head


# ---------------------------------------------------------------------------
# Pure-JAX reference (same bf16-matmul / f32-accumulate recipe) for validation.
# ---------------------------------------------------------------------------
def _ref_block(x, p, n_head):
    B, T, E = x.shape
    H, Dh = n_head, E // n_head
    scale = 1.0 / (Dh ** 0.5)
    xb = x.astype(jnp.bfloat16)
    q = jnp.dot(xb, p["wq"], preferred_element_type=jnp.float32) + p["bq"]
    k = jnp.dot(xb, p["wk"], preferred_element_type=jnp.float32) + p["bk"]
    v = jnp.dot(xb, p["wv"], preferred_element_type=jnp.float32) + p["bv"]

    def heads(t):
        return jnp.transpose(t.reshape(B, T, H, Dh), (0, 2, 1, 3))

    qh = heads(q * scale).astype(jnp.bfloat16)
    kh = heads(k).astype(jnp.bfloat16)
    vh = heads(v).astype(jnp.bfloat16)
    s = jnp.einsum("bhqd,bhkd->bhqk", qh, kh, preferred_element_type=jnp.float32)
    a = jax.nn.softmax(s, axis=-1)
    o = jnp.einsum("bhqk,bhkd->bhqd", a.astype(jnp.bfloat16), vh,
                   preferred_element_type=jnp.float32)
    attn = jnp.transpose(o, (0, 2, 1, 3)).reshape(B, T, E)
    attn_out = jnp.dot(attn.astype(jnp.bfloat16), p["wo"],
                       preferred_element_type=jnp.float32) + p["bo"]
    x1 = _layernorm(x + attn_out, p["g1"], p["b1"])
    h1 = jnp.maximum(jnp.dot(x1.astype(jnp.bfloat16), p["wf1"],
                             preferred_element_type=jnp.float32) + p["bf1"], 0.0)
    ff = jnp.dot(h1.astype(jnp.bfloat16), p["wf2"],
                 preferred_element_type=jnp.float32) + p["bf2"]
    return _layernorm(x1 + ff, p["g2"], p["b2"])


def gpt_reference(params, idx, n_head):
    B, T = idx.shape
    x = (jnp.take(params["wte"], idx, axis=0) + params["wpe"][:T][None]).astype(jnp.float32)
    blocks = params["blocks"]
    L = blocks["wq"].shape[0]
    for l in range(L):
        p = {k: v[l] for k, v in blocks.items()}
        x = _ref_block(x, p, n_head)
    xn = _layernorm(x, params["lnf_g"], params["lnf_b"])
    return jnp.dot(xn.astype(jnp.bfloat16), params["whead"],
                   preferred_element_type=jnp.float32) + params["bhead"]


if __name__ == "__main__":
    vocab_size, block_size, n_embd, n_head, n_layer = 64, 16, 32, 4, 2
    B, T = 2, 8

    key = jax.random.PRNGKey(0)
    kp, ki = jax.random.split(key)
    params = init_params(kp, vocab_size, block_size, n_embd, n_head, n_layer)
    idx = jax.random.randint(ki, (B, T), 0, vocab_size, dtype=jnp.int32)

    logits = jax.block_until_ready(gpt_forward(params, idx, n_head))
    assert logits.shape == (B, T, vocab_size)

    ref = gpt_reference(params, idx, n_head)
    max_diff = float(jnp.max(jnp.abs(logits - ref)))
    assert max_diff < 5e-3, f"mismatch vs reference, max|diff|={max_diff}"

    print("KERNEL_OK")
</pallas_src>

<mosaic_0001>
module attributes {stable_mosaic.version = 11 : i64} {
  func.func @_blocks_kernel(%arg0: i32, %arg1: i32, %arg2: memref<1x8x32xf32, #tpu.memory_space<vmem>>, %arg3: memref<1x32x32xbf16, #tpu.memory_space<vmem>>, %arg4: memref<1x1x32xf32, #tpu.memory_space<vmem>>, %arg5: memref<1x32x32xbf16, #tpu.memory_space<vmem>>, %arg6: memref<1x1x32xf32, #tpu.memory_space<vmem>>, %arg7: memref<1x32x32xbf16, #tpu.memory_space<vmem>>, %arg8: memref<1x1x32xf32, #tpu.memory_space<vmem>>, %arg9: memref<1x32x32xbf16, #tpu.memory_space<vmem>>, %arg10: memref<1x1x32xf32, #tpu.memory_space<vmem>>, %arg11: memref<1x1x32xf32, #tpu.memory_space<vmem>>, %arg12: memref<1x1x32xf32, #tpu.memory_space<vmem>>, %arg13: memref<1x32x128xbf16, #tpu.memory_space<vmem>>, %arg14: memref<1x1x128xf32, #tpu.memory_space<vmem>>, %arg15: memref<1x128x32xbf16, #tpu.memory_space<vmem>>, %arg16: memref<1x1x32xf32, #tpu.memory_space<vmem>>, %arg17: memref<1x1x32xf32, #tpu.memory_space<vmem>>, %arg18: memref<1x1x32xf32, #tpu.memory_space<vmem>>, %arg19: memref<1x8x32xf32, #tpu.memory_space<vmem>>) attributes {dimension_semantics = [#tpu.dimension_semantics<parallel>, #tpu.dimension_semantics<arbitrary>], iteration_bounds = array<i64: 2, 2>, scalar_prefetch = 0 : i64, scratch_operands = 0 : i64, tpu.core_type = #tpu.core_type<tc>, window_params = [{transform_indices = @transform_0, window_bounds = array<i64: 1, 8, 32>}, {transform_indices = @transform_1, window_bounds = array<i64: 1, 32, 32>}, {transform_indices = @transform_2, window_bounds = array<i64: 1, 1, 32>}, {transform_indices = @transform_3, window_bounds = array<i64: 1, 32, 32>}, {transform_indices = @transform_4, window_bounds = array<i64: 1, 1, 32>}, {transform_indices = @transform_5, window_bounds = array<i64: 1, 32, 32>}, {transform_indices = @transform_6, window_bounds = array<i64: 1, 1, 32>}, {transform_indices = @transform_7, window_bounds = array<i64: 1, 32, 32>}, {transform_indices = @transform_8, window_bounds = array<i64: 1, 1, 32>}, {transform_indices = @transform_9, window_bounds = array<i64: 1, 1, 32>}, {transform_indices = @transform_10, window_bounds = array<i64: 1, 1, 32>}, {transform_indices = @transform_11, window_bounds = array<i64: 1, 32, 128>}, {transform_indices = @transform_12, window_bounds = array<i64: 1, 1, 128>}, {transform_indices = @transform_13, window_bounds = array<i64: 1, 128, 32>}, {transform_indices = @transform_14, window_bounds = array<i64: 1, 1, 32>}, {transform_indices = @transform_15, window_bounds = array<i64: 1, 1, 32>}, {transform_indices = @transform_16, window_bounds = array<i64: 1, 1, 32>}, {transform_indices = @transform_17, window_bounds = array<i64: 1, 8, 32>}]} {
    %c0_i32 = arith.constant 0 : i32
    %0 = arith.cmpi eq, %arg1, %c0_i32 : i32
    %1 = arith.extui %0 : i1 to i32
    %c0_i32_0 = arith.constant 0 : i32
    %2 = arith.cmpi ne, %1, %c0_i32_0 : i32
    scf.if %2 {
      %c0_75 = arith.constant 0 : index
      %c0_76 = arith.constant 0 : index
      %c0_77 = arith.constant 0 : index
      %136 = vector.load %arg2[%c0_75, %c0_76, %c0_77] : memref<1x8x32xf32, #tpu.memory_space<vmem>>, vector<1x8x32xf32>
      %c0_78 = arith.constant 0 : index
      %c0_79 = arith.constant 0 : index
      %c0_80 = arith.constant 0 : index
      %137 = vector.load %arg19[%c0_78, %c0_79, %c0_80] : memref<1x8x32xf32, #tpu.memory_space<vmem>>, vector<1x8x32xf32>
      tpu.vector_store %arg19[%c0_78, %c0_79, %c0_80], %136 {strides = array<i32>} : memref<1x8x32xf32, #tpu.memory_space<vmem>>, vector<1x8x32xf32>,
    } else {
    }
    %c0 = arith.constant 0 : index
    %c0_1 = arith.constant 0 : index
    %c0_2 = arith.constant 0 : index
    %3 = vector.load %arg19[%c0, %c0_1, %c0_2] : memref<1x8x32xf32, #tpu.memory_space<vmem>>, vector<1x8x32xf32>
    %4 = vector.shape_cast %3 : vector<1x8x32xf32> to vector<8x32xf32>
    %5 = arith.truncf %4 : vector<8x32xf32> to vector<8x32xbf16>
    %c0_3 = arith.constant 0 : index
    %c0_4 = arith.constant 0 : index
    %c0_5 = arith.constant 0 : index
    %6 = vector.load %arg3[%c0_3, %c0_4, %c0_5] : memref<1x32x32xbf16, #tpu.memory_space<vmem>>, vector<1x32x32xbf16>
    %7 = vector.shape_cast %6 : vector<1x32x32xbf16> to vector<32x32xbf16>
    %cst = arith.constant dense<0.000000e+00> : vector<8x32xf32>
    %8 = tpu.matmul %5, %7, %cst {dimension_numbers = #tpu.dot_dimension_numbers<[1], [0], [0], [1], [0, 0, 1, 1], [], []>} : vector<8x32xbf16>, vector<32x32xbf16>, vector<8x32xf32> -> vector<8x32xf32>
    %c0_6 = arith.constant 0 : index
    %c0_7 = arith.constant 0 : index
    %c0_8 = arith.constant 0 : index
    %9 = vector.load %arg4[%c0_6, %c0_7, %c0_8] : memref<1x1x32xf32, #tpu.memory_space<vmem>>, vector<1x1x32xf32>
    %10 = vector.shape_cast %9 : vector<1x1x32xf32> to vector<1x32xf32>
    %11 = vector.broadcast %10 : vector<1x32xf32> to vector<8x32xf32>
    %12 = arith.addf %8, %11 : vector<8x32xf32>
    %c0_9 = arith.constant 0 : index
    %c0_10 = arith.constant 0 : index
    %c0_11 = arith.constant 0 : index
    %13 = vector.load %arg5[%c0_9, %c0_10, %c0_11] : memref<1x32x32xbf16, #tpu.memory_space<vmem>>, vector<1x32x32xbf16>
    %14 = vector.shape_cast %13 : vector<1x32x32xbf16> to vector<32x32xbf16>
    %cst_12 = arith.constant dense<0.000000e+00> : vector<8x32xf32>
    %15 = tpu.matmul %5, %14, %cst_12 {dimension_numbers = #tpu.dot_dimension_numbers<[1], [0], [0], [1], [0, 0, 1, 1], [], []>} : vector<8x32xbf16>, vector<32x32xbf16>, vector<8x32xf32> -> vector<8x32xf32>
    %c0_13 = arith.constant 0 : index
    %c0_14 = arith.constant 0 : index
    %c0_15 = arith.constant 0 : index
    %16 = vector.load %arg6[%c0_13, %c0_14, %c0_15] : memref<1x1x32xf32, #tpu.memory_space<vmem>>, vector<1x1x32xf32>
    %17 = vector.shape_cast %16 : vector<1x1x32xf32> to vector<1x32xf32>
    %18 = vector.broadcast %17 : vector<1x32xf32> to vector<8x32xf32>
    %19 = arith.addf %15, %18 : vector<8x32xf32>
    %c0_16 = arith.constant 0 : index
    %c0_17 = arith.constant 0 : index
    %c0_18 = arith.constant 0 : index
    %20 = vector.load %arg7[%c0_16, %c0_17, %c0_18] : memref<1x32x32xbf16, #tpu.memory_space<vmem>>, vector<1x32x32xbf16>
    %21 = vector.shape_cast %20 : vector<1x32x32xbf16> to vector<32x32xbf16>
    %cst_19 = arith.constant dense<0.000000e+00> : vector<8x32xf32>
    %22 = tpu.matmul %5, %21, %cst_19 {dimension_numbers = #tpu.dot_dimension_numbers<[1], [0], [0], [1], [0, 0, 1, 1], [], []>} : vector<8x32xbf16>, vector<32x32xbf16>, vector<8x32xf32> -> vector<8x32xf32>
    %c0_20 = arith.constant 0 : index
    %c0_21 = arith.constant 0 : index
    %c0_22 = arith.constant 0 : index
    %23 = vector.load %arg8[%c0_20, %c0_21, %c0_22] : memref<1x1x32xf32, #tpu.memory_space<vmem>>, vector<1x1x32xf32>
    %24 = vector.shape_cast %23 : vector<1x1x32xf32> to vector<1x32xf32>
    %25 = vector.broadcast %24 : vector<1x32xf32> to vector<8x32xf32>
    %26 = arith.addf %22, %25 : vector<8x32xf32>
    %cst_23 = arith.constant 0.353553385 : f32
    %27 = vector.broadcast %cst_23 : f32 to vector<8x32xf32>
    %28 = arith.mulf %12, %27 : vector<8x32xf32>
    %29 = vector.shape_cast %28 : vector<8x32xf32> to vector<8x4x8xf32>
    %30 = tpu.transpose %29, [1, 0, 2] : vector<8x4x8xf32> -> vector<4x8x8xf32>
    %31 = arith.truncf %30 : vector<4x8x8xf32> to vector<4x8x8xbf16>
    %32 = vector.shape_cast %19 : vector<8x32xf32> to vector<8x4x8xf32>
    %33 = tpu.transpose %32, [1, 0, 2] : vector<8x4x8xf32> -> vector<4x8x8xf32>
    %34 = arith.truncf %33 : vector<4x8x8xf32> to vector<4x8x8xbf16>
    %35 = vector.shape_cast %26 : vector<8x32xf32> to vector<8x4x8xf32>
    %36 = tpu.transpose %35, [1, 0, 2] : vector<8x4x8xf32> -> vector<4x8x8xf32>
    %37 = arith.truncf %36 : vector<4x8x8xf32> to vector<4x8x8xbf16>
    "tpu.trace_start"() <{level = 10 : i32, message = "hqd,hkd->hqk"}> : () -> ()
    %cst_24 = arith.constant dense<0.000000e+00> : vector<4x8x8xf32>
    %38 = tpu.matmul %31, %34, %cst_24 {dimension_numbers = #tpu.dot_dimension_numbers<[2], [2], [1], [1], [0, 0, 0, 1, 1, 1], [0], [0]>} : vector<4x8x8xbf16>, vector<4x8x8xbf16>, vector<4x8x8xf32> -> vector<4x8x8xf32>
    "tpu.trace_stop"() : () -> ()
    %cst_25 = arith.constant dense<0xFF800000> : vector<4x8xf32>
    %39 = vector.multi_reduction <maximumf>, %38, %cst_25 [2] : vector<4x8x8xf32> to vector<4x8xf32>
    %40 = vector.shape_cast %39 : vector<4x8xf32> to vector<4x8x1xf32>
    %41 = vector.broadcast %40 : vector<4x8x1xf32> to vector<4x8x8xf32>
    %42 = arith.subf %38, %41 : vector<4x8x8xf32>
    %43 = math.exp %42 : vector<4x8x8xf32>
    %cst_26 = arith.constant dense<0.000000e+00> : vector<4x8xf32>
    %44 = vector.multi_reduction <add>, %43, %cst_26 [2] : vector<4x8x8xf32> to vector<4x8xf32>
    %45 = vector.shape_cast %44 : vector<4x8xf32> to vector<4x8x1xf32>
    %46 = tpu.reciprocal %45 {approx = true} : vector<4x8x1xf32> -> vector<4x8x1xf32>
    %47 = vector.broadcast %46 : vector<4x8x1xf32> to vector<4x8x8xf32>
    %48 = arith.mulf %43, %47 : vector<4x8x8xf32>
    %49 = arith.truncf %48 : vector<4x8x8xf32> to vector<4x8x8xbf16>
    "tpu.trace_start"() <{level = 10 : i32, message = "hqk,hkd->hqd"}> : () -> ()
    %cst_27 = arith.constant dense<0.000000e+00> : vector<4x8x8xf32>
    %50 = tpu.matmul %49, %37, %cst_27 {dimension_numbers = #tpu.dot_dimension_numbers<[2], [1], [1], [2], [0, 0, 0, 1, 1, 2], [0], [0]>} : vector<4x8x8xbf16>, vector<4x8x8xbf16>, vector<4x8x8xf32> -> vector<4x8x8xf32>
    "tpu.trace_stop"() : () -> ()
    %51 = tpu.transpose %50, [1, 0, 2] : vector<4x8x8xf32> -> vector<8x4x8xf32>
    %52 = vector.shape_cast %51 : vector<8x4x8xf32> to vector<8x32xf32>
    %53 = arith.truncf %52 : vector<8x32xf32> to vector<8x32xbf16>
    %c0_28 = arith.constant 0 : index
    %c0_29 = arith.constant 0 : index
    %c0_30 = arith.constant 0 : index
    %54 = vector.load %arg9[%c0_28, %c0_29, %c0_30] : memref<1x32x32xbf16, #tpu.memory_space<vmem>>, vector<1x32x32xbf16>
    %55 = vector.shape_cast %54 : vector<1x32x32xbf16> to vector<32x32xbf16>
    %cst_31 = arith.constant dense<0.000000e+00> : vector<8x32xf32>
    %56 = tpu.matmul %53, %55, %cst_31 {dimension_numbers = #tpu.dot_dimension_numbers<[1], [0], [0], [1], [0, 0, 1, 1], [], []>} : vector<8x32xbf16>, vector<32x32xbf16>, vector<8x32xf32> -> vector<8x32xf32>
    %c0_32 = arith.constant 0 : index
    %c0_33 = arith.constant 0 : index
    %c0_34 = arith.constant 0 : index
    %57 = vector.load %arg10[%c0_32, %c0_33, %c0_34] : memref<1x1x32xf32, #tpu.memory_space<vmem>>, vector<1x1x32xf32>
    %58 = vector.shape_cast %57 : vector<1x1x32xf32> to vector<1x32xf32>
    %59 = vector.broadcast %58 : vector<1x32xf32> to vector<8x32xf32>
    %60 = arith.addf %56, %59 : vector<8x32xf32>
    %61 = arith.addf %4, %60 : vector<8x32xf32>
    %c0_35 = arith.constant 0 : index
    %c0_36 = arith.constant 0 : index
    %c0_37 = arith.constant 0 : index
    %62 = vector.load %arg11[%c0_35, %c0_36, %c0_37] : memref<1x1x32xf32, #tpu.memory_space<vmem>>, vector<1x1x32xf32>
    %63 = vector.shape_cast %62 : vector<1x1x32xf32> to vector<1x32xf32>
    %c0_38 = arith.constant 0 : index
    %c0_39 = arith.constant 0 : index
    %c0_40 = arith.constant 0 : index
    %64 = vector.load %arg12[%c0_38, %c0_39, %c0_40] : memref<1x1x32xf32, #tpu.memory_space<vmem>>, vector<1x1x32xf32>
    %65 = vector.shape_cast %64 : vector<1x1x32xf32> to vector<1x32xf32>
    %cst_41 = arith.constant dense<0.000000e+00> : vector<8xf32>
    %66 = vector.multi_reduction <add>, %61, %cst_41 [1] : vector<8x32xf32> to vector<8xf32>
    %67 = vector.shape_cast %66 : vector<8xf32> to vector<8x1xf32>
    %cst_42 = arith.constant 3.200000e+01 : f32
    %68 = vector.broadcast %cst_42 : f32 to vector<8x1xf32>
    %69 = arith.divf %67, %68 : vector<8x1xf32>
    %70 = vector.broadcast %69 : vector<8x1xf32> to vector<8x32xf32>
    %71 = arith.subf %61, %70 : vector<8x32xf32>
    %72 = arith.mulf %71, %71 : vector<8x32xf32>
    %cst_43 = arith.constant dense<0.000000e+00> : vector<8xf32>
    %73 = vector.multi_reduction <add>, %72, %cst_43 [1] : vector<8x32xf32> to vector<8xf32>
    %74 = vector.shape_cast %73 : vector<8xf32> to vector<8x1xf32>
    %cst_44 = arith.constant 3.200000e+01 : f32
    %75 = vector.broadcast %cst_44 : f32 to vector<8x1xf32>
    %76 = arith.divf %74, %75 : vector<8x1xf32>
    %77 = vector.broadcast %69 : vector<8x1xf32> to vector<8x32xf32>
    %78 = arith.subf %61, %77 : vector<8x32xf32>
    %cst_45 = arith.constant 9.99999974E-6 : f32
    %79 = vector.broadcast %cst_45 : f32 to vector<8x1xf32>
    %80 = arith.addf %76, %79 : vector<8x1xf32>
    %81 = math.rsqrt %80 : vector<8x1xf32>
    %82 = vector.broadcast %81 : vector<8x1xf32> to vector<8x32xf32>
    %83 = arith.mulf %78, %82 : vector<8x32xf32>
    %84 = vector.broadcast %63 : vector<1x32xf32> to vector<8x32xf32>
    %85 = arith.mulf %83, %84 : vector<8x32xf32>
    %86 = vector.broadcast %65 : vector<1x32xf32> to vector<8x32xf32>
    %87 = arith.addf %85, %86 : vector<8x32xf32>
    %88 = arith.truncf %87 : vector<8x32xf32> to vector<8x32xbf16>
    %c0_46 = arith.constant 0 : index
    %c0_47 = arith.constant 0 : index
    %c0_48 = arith.constant 0 : index
    %89 = vector.load %arg13[%c0_46, %c0_47, %c0_48] : memref<1x32x128xbf16, #tpu.memory_space<vmem>>, vector<1x32x128xbf16>
    %90 = vector.shape_cast %89 : vector<1x32x128xbf16> to vector<32x128xbf16>
    %cst_49 = arith.constant dense<0.000000e+00> : vector<8x128xf32>
    %91 = tpu.matmul %88, %90, %cst_49 {dimension_numbers = #tpu.dot_dimension_numbers<[1], [0], [0], [1], [0, 0, 1, 1], [], []>} : vector<8x32xbf16>, vector<32x128xbf16>, vector<8x128xf32> -> vector<8x128xf32>
    %c0_50 = arith.constant 0 : index
    %c0_51 = arith.constant 0 : index
    %c0_52 = arith.constant 0 : index
    %92 = vector.load %arg14[%c0_50, %c0_51, %c0_52] : memref<1x1x128xf32, #tpu.memory_space<vmem>>, vector<1x1x128xf32>
    %93 = vector.shape_cast %92 : vector<1x1x128xf32> to vector<1x128xf32>
    %94 = vector.broadcast %93 : vector<1x128xf32> to vector<8x128xf32>
    %95 = arith.addf %91, %94 : vector<8x128xf32>
    %cst_53 = arith.constant 0.000000e+00 : f32
    %96 = vector.broadcast %cst_53 : f32 to vector<8x128xf32>
    %97 = arith.maximumf %95, %96 : vector<8x128xf32>
    %98 = arith.truncf %97 : vector<8x128xf32> to vector<8x128xbf16>
    %c0_54 = arith.constant 0 : index
    %c0_55 = arith.constant 0 : index
    %c0_56 = arith.constant 0 : index
    %99 = vector.load %arg15[%c0_54, %c0_55, %c0_56] : memref<1x128x32xbf16, #tpu.memory_space<vmem>>, vector<1x128x32xbf16>
    %100 = vector.shape_cast %99 : vector<1x128x32xbf16> to vector<128x32xbf16>
    %cst_57 = arith.constant dense<0.000000e+00> : vector<8x32xf32>
    %101 = tpu.matmul %98, %100, %cst_57 {dimension_numbers = #tpu.dot_dimension_numbers<[1], [0], [0], [1], [0, 0, 1, 1], [], []>} : vector<8x128xbf16>, vector<128x32xbf16>, vector<8x32xf32> -> vector<8x32xf32>
    %c0_58 = arith.constant 0 : index
    %c0_59 = arith.constant 0 : index
    %c0_60 = arith.constant 0 : index
    %102 = vector.load %arg16[%c0_58, %c0_59, %c0_60] : memref<1x1x32xf32, #tpu.memory_space<vmem>>, vector<1x1x32xf32>
    %103 = vector.shape_cast %102 : vector<1x1x32xf32> to vector<1x32xf32>
    %104 = vector.broadcast %103 : vector<1x32xf32> to vector<8x32xf32>
    %105 = arith.addf %101, %104 : vector<8x32xf32>
    %106 = arith.addf %87, %105 : vector<8x32xf32>
    %c0_61 = arith.constant 0 : index
    %c0_62 = arith.constant 0 : index
    %c0_63 = arith.constant 0 : index
    %107 = vector.load %arg17[%c0_61, %c0_62, %c0_63] : memref<1x1x32xf32, #tpu.memory_space<vmem>>, vector<1x1x32xf32>
    %108 = vector.shape_cast %107 : vector<1x1x32xf32> to vector<1x32xf32>
    %c0_64 = arith.constant 0 : index
    %c0_65 = arith.constant 0 : index
    %c0_66 = arith.constant 0 : index
    %109 = vector.load %arg18[%c0_64, %c0_65, %c0_66] : memref<1x1x32xf32, #tpu.memory_space<vmem>>, vector<1x1x32xf32>
    %110 = vector.shape_cast %109 : vector<1x1x32xf32> to vector<1x32xf32>
    %cst_67 = arith.constant dense<0.000000e+00> : vector<8xf32>
    %111 = vector.multi_reduction <add>, %106, %cst_67 [1] : vector<8x32xf32> to vector<8xf32>
    %112 = vector.shape_cast %111 : vector<8xf32> to vector<8x1xf32>
    %cst_68 = arith.constant 3.200000e+01 : f32
    %113 = vector.broadcast %cst_68 : f32 to vector<8x1xf32>
    %114 = arith.divf %112, %113 : vector<8x1xf32>
    %115 = vector.broadcast %114 : vector<8x1xf32> to vector<8x32xf32>
    %116 = arith.subf %106, %115 : vector<8x32xf32>
    %117 = arith.mulf %116, %116 : vector<8x32xf32>
    %cst_69 = arith.constant dense<0.000000e+00> : vector<8xf32>
    %118 = vector.multi_reduction <add>, %117, %cst_69 [1] : vector<8x32xf32> to vector<8xf32>
    %119 = vector.shape_cast %118 : vector<8xf32> to vector<8x1xf32>
    %cst_70 = arith.constant 3.200000e+01 : f32
    %120 = vector.broadcast %cst_70 : f32 to vector<8x1xf32>
    %121 = arith.divf %119, %120 : vector<8x1xf32>
    %122 = vector.broadcast %114 : vector<8x1xf32> to vector<8x32xf32>
    %123 = arith.subf %106, %122 : vector<8x32xf32>
    %cst_71 = arith.constant 9.99999974E-6 : f32
    %124 = vector.broadcast %cst_71 : f32 to vector<8x1xf32>
    %125 = arith.addf %121, %124 : vector<8x1xf32>
    %126 = math.rsqrt %125 : vector<8x1xf32>
    %127 = vector.broadcast %126 : vector<8x1xf32> to vector<8x32xf32>
    %128 = arith.mulf %123, %127 : vector<8x32xf32>
    %129 = vector.broadcast %108 : vector<1x32xf32> to vector<8x32xf32>
    %130 = arith.mulf %128, %129 : vector<8x32xf32>
    %131 = vector.broadcast %110 : vector<1x32xf32> to vector<8x32xf32>
    %132 = arith.addf %130, %131 : vector<8x32xf32>
    %c0_72 = arith.constant 0 : index
    %c0_73 = arith.constant 0 : index
    %c0_74 = arith.constant 0 : index
    %133 = vector.load %arg19[%c0_72, %c0_73, %c0_74] : memref<1x8x32xf32, #tpu.memory_space<vmem>>, vector<1x8x32xf32>
    %134 = vector.shape_cast %133 : vector<1x8x32xf32> to vector<8x32xf32>
    %135 = vector.shape_cast %132 : vector<8x32xf32> to vector<1x8x32xf32>
    tpu.vector_store %arg19[%c0_72, %c0_73, %c0_74], %135 {strides = array<i32>} : memref<1x8x32xf32, #tpu.memory_space<vmem>>, vector<1x8x32xf32>,
    return
  }
  func.func @transform_0(%arg0: i32, %arg1: i32) -> (i32, i32, i32) {
    %c0_i32 = arith.constant 0 : i32
    %c0_i32_0 = arith.constant 0 : i32
    %c0_i32_1 = arith.constant 0 : i32
    return %arg0, %c0_i32, %c0_i32_0 : i32, i32, i32
  }
  func.func @transform_1(%arg0: i32, %arg1: i32) -> (i32, i32, i32) {
    %c0_i32 = arith.constant 0 : i32
    %c0_i32_0 = arith.constant 0 : i32
    %c0_i32_1 = arith.constant 0 : i32
    return %arg1, %c0_i32, %c0_i32_0 : i32, i32, i32
  }
  func.func @transform_2(%arg0: i32, %arg1: i32) -> (i32, i32, i32) {
    %c0_i32 = arith.constant 0 : i32
    %c0_i32_0 = arith.constant 0 : i32
    %c0_i32_1 = arith.constant 0 : i32
    return %arg1, %c0_i32, %c0_i32_0 : i32, i32, i32
  }
  func.func @transform_3(%arg0: i32, %arg1: i32) -> (i32, i32, i32) {
    %c0_i32 = arith.constant 0 : i32
    %c0_i32_0 = arith.constant 0 : i32
    %c0_i32_1 = arith.constant 0 : i32
    return %arg1, %c0_i32, %c0_i32_0 : i32, i32, i32
  }
  func.func @transform_4(%arg0: i32, %arg1: i32) -> (i32, i32, i32) {
    %c0_i32 = arith.constant 0 : i32
    %c0_i32_0 = arith.constant 0 : i32
    %c0_i32_1 = arith.constant 0 : i32
    return %arg1, %c0_i32, %c0_i32_0 : i32, i32, i32
  }
  func.func @transform_5(%arg0: i32, %arg1: i32) -> (i32, i32, i32) {
    %c0_i32 = arith.constant 0 : i32
    %c0_i32_0 = arith.constant 0 : i32
    %c0_i32_1 = arith.constant 0 : i32
    return %arg1, %c0_i32, %c0_i32_0 : i32, i32, i32
  }
  func.func @transform_6(%arg0: i32, %arg1: i32) -> (i32, i32, i32) {
    %c0_i32 = arith.constant 0 : i32
    %c0_i32_0 = arith.constant 0 : i32
    %c0_i32_1 = arith.constant 0 : i32
    return %arg1, %c0_i32, %c0_i32_0 : i32, i32, i32
  }
  func.func @transform_7(%arg0: i32, %arg1: i32) -> (i32, i32, i32) {
    %c0_i32 = arith.constant 0 : i32
    %c0_i32_0 = arith.constant 0 : i32
    %c0_i32_1 = arith.constant 0 : i32
    return %arg1, %c0_i32, %c0_i32_0 : i32, i32, i32
  }
  func.func @transform_8(%arg0: i32, %arg1: i32) -> (i32, i32, i32) {
    %c0_i32 = arith.constant 0 : i32
    %c0_i32_0 = arith.constant 0 : i32
    %c0_i32_1 = arith.constant 0 : i32
    return %arg1, %c0_i32, %c0_i32_0 : i32, i32, i32
  }
  func.func @transform_9(%arg0: i32, %arg1: i32) -> (i32, i32, i32) {
    %c0_i32 = arith.constant 0 : i32
    %c0_i32_0 = arith.constant 0 : i32
    %c0_i32_1 = arith.constant 0 : i32
    return %arg1, %c0_i32, %c0_i32_0 : i32, i32, i32
  }
  func.func @transform_10(%arg0: i32, %arg1: i32) -> (i32, i32, i32) {
    %c0_i32 = arith.constant 0 : i32
    %c0_i32_0 = arith.constant 0 : i32
    %c0_i32_1 = arith.constant 0 : i32
    return %arg1, %c0_i32, %c0_i32_0 : i32, i32, i32
  }
  func.func @transform_11(%arg0: i32, %arg1: i32) -> (i32, i32, i32) {
    %c0_i32 = arith.constant 0 : i32
    %c0_i32_0 = arith.constant 0 : i32
    %c0_i32_1 = arith.constant 0 : i32
    return %arg1, %c0_i32, %c0_i32_0 : i32, i32, i32
  }
  func.func @transform_12(%arg0: i32, %arg1: i32) -> (i32, i32, i32) {
    %c0_i32 = arith.constant 0 : i32
    %c0_i32_0 = arith.constant 0 : i32
    %c0_i32_1 = arith.constant 0 : i32
    return %arg1, %c0_i32, %c0_i32_0 : i32, i32, i32
  }
  func.func @transform_13(%arg0: i32, %arg1: i32) -> (i32, i32, i32) {
    %c0_i32 = arith.constant 0 : i32
    %c0_i32_0 = arith.constant 0 : i32
    %c0_i32_1 = arith.constant 0 : i32
    return %arg1, %c0_i32, %c0_i32_0 : i32, i32, i32
  }
  func.func @transform_14(%arg0: i32, %arg1: i32) -> (i32, i32, i32) {
    %c0_i32 = arith.constant 0 : i32
    %c0_i32_0 = arith.constant 0 : i32
    %c0_i32_1 = arith.constant 0 : i32
    return %arg1, %c0_i32, %c0_i32_0 : i32, i32, i32
  }
  func.func @transform_15(%arg0: i32, %arg1: i32) -> (i32, i32, i32) {
    %c0_i32 = arith.constant 0 : i32
    %c0_i32_0 = arith.constant 0 : i32
    %c0_i32_1 = arith.constant 0 : i32
    return %arg1, %c0_i32, %c0_i32_0 : i32, i32, i32
  }
  func.func @transform_16(%arg0: i32, %arg1: i32) -> (i32, i32, i32) {
    %c0_i32 = arith.constant 0 : i32
    %c0_i32_0 = arith.constant 0 : i32
    %c0_i32_1 = arith.constant 0 : i32
    return %arg1, %c0_i32, %c0_i32_0 : i32, i32, i32
  }
  func.func @transform_17(%arg0: i32, %arg1: i32) -> (i32, i32, i32) {
    %c0_i32 = arith.constant 0 : i32
    %c0_i32_0 = arith.constant 0 : i32
    %c0_i32_1 = arith.constant 0 : i32
    return %arg0, %c0_i32, %c0_i32_0 : i32, i32, i32
  }
}

</mosaic_0001>

<bundles_post_ra>
// kernel: tpu_custom_call.1
= control target key start
LH: loop header
LB: loop body
LE: loop exit
PB: predicated region body
PF: predicated region fallthrough
CT: control target
= control target key end

     0   :  { %s3492_s0 = inlined_call_operand.hbm [shape: f32[2,8,32], index: 0, kind: input, shape index: {}]   ;;  %s3493_s1 = inlined_call_operand.vmem [shape: bf16[2,32,32], index: 1, kind: input, shape index: {}]   ;;  %s3494_s2 = inlined_call_operand.hbm [shape: f32[2,1,32], index: 2, kind: input, shape index: {}]   ;;  %s3495_s3 = inlined_call_operand.vmem [shape: bf16[2,32,32], index: 3, kind: input, shape index: {}]   ;;  %s3496_s4 = inlined_call_operand.vmem [shape: f32[2,1,32], index: 4, kind: input, shape index: {}]   ;;  %s3497_s5 = inlined_call_operand.vmem [shape: bf16[2,32,32], index: 5, kind: input, shape index: {}]   ;;  %s3498_s6 = inlined_call_operand.vmem [shape: f32[2,1,32], index: 6, kind: input, shape index: {}]   ;;  %s3499_s7 = inlined_call_operand.vmem [shape: bf16[2,32,32], index: 7, kind: input, shape index: {}]   ;;  %s3500_s8 = inlined_call_operand.vmem [shape: f32[2,1,32], index: 8, kind: input, shape index: {}]   ;;  %s3501_s9 = inlined_call_operand.hbm [shape: f32[2,1,32], index: 9, kind: input, shape index: {}]   ;;  %s3502_s10 = inlined_call_operand.vmem [shape: f32[2,1,32], index: 10, kind: input, shape index: {}]   ;;  %s3503_s11 = inlined_call_operand.vmem [shape: bf16[2,32,128], index: 11, kind: input, shape index: {}]   ;;  %s3504_s12 = inlined_call_operand.vmem [shape: f32[2,1,128], index: 12, kind: input, shape index: {}]   ;;  %s3505_s13 = inlined_call_operand.vmem [shape: bf16[2,128,32], index: 13, kind: input, shape index: {}]   ;;  %s3506_s14 = inlined_call_operand.vmem [shape: f32[2,1,32], index: 14, kind: input, shape index: {}]   ;;  %s3507_s15 = inlined_call_operand.hbm [shape: f32[2,1,32], index: 15, kind: input, shape index: {}]   ;;  %s3508_s16 = inlined_call_operand.vmem [shape: f32[2,1,32], index: 16, kind: input, shape index: {}]   ;;  %s3509_s17 = inlined_call_operand.hbm [shape: f32[2,8,32], index: 17, kind: output, shape index: {}]  }
   0x1   :  { %3527 = sst [smem:[#allocation31_spill]] %s3492_s0 }
   0x2   :  { %3528 = sst [smem:[#allocation32_spill]] %s3493_s1 }
   0x3   :  { %3529 = sst [smem:[#allocation33_spill]] %s3494_s2 }
   0x4   :  { %3530 = sst [smem:[#allocation34_spill]] %s3495_s3 }
   0x5   :  { %3531 = sst [smem:[#allocation35_spill]] %s3497_s5 }
   0x6   :  { %3532 = sst [smem:[#allocation36_spill]] %s3498_s6 }
   0x7   :  { %3533 = sst [smem:[#allocation37_spill]] %s3499_s7 }
   0x8   :  { %3534 = sst [smem:[#allocation38_spill]] %s3500_s8 }
   0x9   :  { %3535 = sst [smem:[#allocation39_spill]] %s3501_s9 }
   0xa   :  { %3536 = sst [smem:[#allocation40_spill]] %s3502_s10 }
   0xb   :  { %3537 = sst [smem:[#allocation41_spill]] %s3503_s11 }
   0xc   :  { %3538 = sst [smem:[#allocation42_spill]] %s3504_s12 }
   0xd   :  { %3539 = sst [smem:[#allocation43_spill]] %s3505_s13 }
   0xe   :  { %3540 = sst [smem:[#allocation44_spill]] %s3506_s14 }
   0xf   :  { %3541 = sst [smem:[#allocation45_spill]] %s3507_s15 }
  0x10   :  { %3542 = sst [smem:[#allocation46_spill]] %s3508_s16 }
  0x11   :  { %3543 = sst [smem:[#allocation47_spill]] %s3509_s17 }
  0x12   :  { %22 = vsyncpa [#allocation3], 0 }
  0x13   :  { %24 = vsyncpa [#allocation3 + $0x1], 0 }
  0x14   :  { %25 = vsyncpa [#allocation6], 0 }
  0x15   :  { %27 = vsyncpa [#allocation6 + $0x1], 0 }
  0x16   :  { %28 = vsyncpa [#allocation9], 0 }
  0x17   :  { %30 = vsyncpa [#allocation9 + $0x1], 0 }
  0x18   :  { %31 = vsyncpa [#allocation4], 0 }
  0x19   :  { %33 = vsyncpa [#allocation4 + $0x1], 0  ;;  %s2875_s24 = smov 0   ;;  %s2877_s25 = smov 0  }
  0x1a   :  { %s2879_s26 = smov 0   ;;  %s2881_s27 = smov 0  }
  0x1b   :  { %s2883_s28 = smov 0   ;;  %s2885_s29 = smov 0  }
  0x1c   :  { %s2887_s0 = smov 0   ;;  %s2889_s30 = smov 0  }
  0x1d   :  { %s2891_s18 = smov 0   ;;  %s2893_s19 = smov 0  }
  0x1e   :  { %s2895_s1 = smov 0  }
  0x1f LB: > { %3544 = sst [smem:[#allocation15_spill]] %s2738_s25  ;;  %s2929_s20 = sadd.s32 4294967295, %s2774_s1   ;;  %s2774_s1 = sphi %s2895_s1, %s39_s1   ;;  %s2770_s19 = sphi %s2893_s19, %s3614_s19   ;;  %s2766_s18 = sphi %s2891_s18, %s3613_s18   ;;  %s2762_s30 = sphi %s2889_s30, %s3612_s30   ;;  %s2758_s0 = sphi %s2887_s0, %s3611_s0   ;;  %s2754_s29 = sphi %s2885_s29, %s3610_s29   ;;  %s2750_s28 = sphi %s2883_s28, %s3609_s28   ;;  %s2746_s27 = sphi %s2881_s27, %s3608_s27   ;;  %s2742_s26 = sphi %s2879_s26, %s3607_s26   ;;  %s2738_s25 = sphi %s2877_s25, %s3606_s25   ;;  %s2734_s24 = sphi %s2875_s24, %s3605_s24  }
  0x20   : > { %3545 = sst [smem:[#allocation16_spill]] %s2742_s26  ;;  %s48_s21 = sadd.s32 1, %s2766_s18 }
  0x21   : > { %3546 = sst [smem:[#allocation17_spill]] %s2746_s27  ;;  %p2932_p0 = scmp.ge.s32.totalorder %s48_s21, 2 }
  0x22   : > { %3547 = sst [smem:[#allocation18_spill]] %s2750_s28  ;;  %p66_p1 = scmp.eq.s32.totalorder %s2774_s1, 0 }
  0x23   : > { %3548 = sst [smem:[#allocation19_spill]] %s2754_s29  ;;  %p72_p2 = scmp.eq.s32.totalorder %s2929_s20, 0 }
  0x24   : > { %3549 = sst [smem:[#allocation20_spill]] %s2762_s30  ;;  %s110_s23 = sadd.s32 1, %s2742_s26 }
  0x25   : > { %3550 = sst [smem:[#allocation21_spill]] %s2766_s18  ;;  %s3616_s21 = smov (%p2932_p0, %s48_s21), 0 }
  0x26   : > { %3551 = sst [smem:[#allocation22_spill]] %s2770_s19  ;;  %p117_p3 = scmp.ne.s32.totalorder %s2742_s26, %s2738_s25 }
  0x27   : > { %3552 = sst [smem:[#allocation23_spill]] %s2774_s1  ;;  %p123_p4 = scmp.ne.s32.totalorder %s2738_s25, %s2734_s24 }
  0x28   : > { %3554 = sst [smem:[#allocation24_spill]] %s3616_s21  ;;  %s107_s17 = ssub.s32 %s2766_s18, %s3616_s21 }
  0x29   : > { %p108_p5 = scmp.eq.s32.totalorder %s107_s17, 0  ;;  %p119_p6 = por %p117_p3, %p66_p1 }
  0x2a   : > { %p2952_p7 = por %p123_p4, %p72_p2  ;;  %p2393_p8 = scmp.lt.s32.totalorder %s2774_s1, 4 }
  0x2b   : > { %s2958_s16 = scalar_select %p108_p5, %s2742_s26, %s110_s23  }
  0x2c   : > { %s564_s14 = sand.u32 1, %s2774_s1   ;;  %s2962_s24 = sand.u32 1, %s2742_s26  }
  0x2d   : > { %3556 = sst [smem:[#allocation25_spill]] %s2958_s16  ;;  %s567_s12 = scalar_lea.vmem [#allocation5], %s2962_s24 }
  0x2e   : > { %s3557_s2 = sld [smem:[#allocation33_spill]]  ;;  %s574_s11 = sshll.u32 %s567_s12, 4  ;;  %s575_s11 = int_to_ptr.vmem [resolvable:$true] %s574_s11 }
  0x2f   : > { %p2971_p9 = pnand %p2393_p8, %p119_p6  ;;  %p2237_p10 = scmp.ge.s32.totalorder %s2774_s1, 1 }
  0x30   : > { %p695_p11 = scmp.lt.s32.totalorder %s2774_s1, 5  ;;  %s2977_s13 = scalar_lea.sflag [#allocation6], %s564_s14 }
  0x31   : > { %s2232_s21 = sadd.s32 4294967294, %s2774_s1   ;;  %p65_p13 = scmp.ne.s32.totalorder %s2754_s29, %s2750_s28 }
  0x32   : > { %p2982_p12 = pnand %p2237_p10, %p695_p11  ;;  %p71_p4 = scmp.ne.s32.totalorder %s2750_s28, %s2746_s27 }
  0x33   : > { %p2998_p5 = por %p66_p1, %p65_p13  ;;  %p511_p6 = scmp.eq.s32.totalorder %s2929_s20, 3 }
  0x34   : > { %s570_s17 = scalar_lea.hbm %s3557_s2, %s2766_s18  ;;  %s58_s2 = sadd.s32 1, %s2754_s29 }
  0x35   : > { %s572_s23 = sshll.u32 %s570_s17, 4  ;;  %s51_s17 = sadd.s32 1, %s2770_s19  ;;  %s573_s23 = int_to_ptr.hbm [resolvable:$true] %s572_s23 }
  0x36   : > { %2382 = dma.hbm_to_vmem [thread:$0]  (!%p2971_p9), %s573_s23, 16, %s575_s11, %s2977_s13  }
  0x37   : > { %s3618_s17 = smov (!%p2932_p0, %s51_s17), %s2770_s19  ;;  %p3007_p10 = por %p72_p2, %p71_p4 }
  0x38   : > { %p53_p3 = scmp.ge.s32.totalorder %s3618_s17, 2  ;;  %p3011_p0 = por %p511_p6, %p65_p13 }
  0x39   : > { %p517_p1 = scmp.eq.s32.totalorder %s2232_s21, 3  ;;  %s537_s26 = sand.u32 1, %s2754_s29  }
  0x3a   : > { %s3620_s17 = smov (%p53_p3, %s3618_s17), 0  ;;  %s2235_s8 = sshll.u32 %s537_s26, 3 }
  0x3b   : > { %3561 = sst [smem:[#allocation26_spill]] %s3620_s17  ;;  %s55_s23 = ssub.s32 %s2770_s19, %s3620_s17 }
  0x3c   : > { %s3563_s22 = scalar_select %p3011_p0, 1, 0 }
  0x3d   : > { %p56_p11 = scmp.eq.s32.totalorder %s55_s23, 0  ;;  %p3018_p3 = por %p517_p1, %p71_p4 }
  0x3e   : > { %3564 = sst [smem:[#allocation27_spill]] %s3563_s22  ;;  %s2236_s7 = sshll.u32 %s2770_s19, 3 }
  0x3f   : > { %s3565_s27 = scalar_select %p3018_p3, 1, 0 }
  0x40   : > { %s3023_s10 = scalar_select %p56_p11, %s2754_s29, %s58_s2  }
  0x41   : > { %3566 = sst [smem:[#allocation28_spill]] %s3565_s27  ;;  %s541_s21 = scalar_lea.vmem [#allocation2], %s2235_s8 }
  0x42   : > { %3567 = sst [smem:[#allocation29_spill]] %s3023_s10  ;;  %s549_s23 = sshll.u32 %s541_s21, 4  ;;  %s550_s23 = int_to_ptr.vmem [resolvable:$true] %s549_s23 }
  0x43   : > { %s3568_s3 = sld [smem:[#allocation31_spill]]  ;;  %p2377_p2 = pnand %p2393_p8, %p2998_p5 }
  0x44   : > { %s3569_s9 = sld [smem:[#allocation39_spill]]  ;;  %s626_s5 = scalar_lea.vmem [#allocation7], %s2962_s24 }
  0x45   : > { %s633_s6 = sshll.u32 %s626_s5, 4  ;;  %s3570_s15 = sld [smem:[#allocation45_spill]]  ;;  %s634_s6 = int_to_ptr.vmem [resolvable:$true] %s633_s6 }
  0x46   : > { %s675_s10 = scalar_lea.sflag [#allocation9], %s2962_s24 }
  0x49   : > { %s545_s22 = scalar_lea.hbm %s3568_s3, %s2236_s7  ;;  %s538_s3 = scalar_lea.sflag [#allocation3], %s537_s26 }
  0x4a   : > { %s547_s17 = sshll.u32 %s545_s22, 4  ;;  %s629_s19 = scalar_lea.hbm %s3569_s9, %s2766_s18  ;;  %s548_s17 = int_to_ptr.hbm [resolvable:$true] %s547_s17 }
  0x4b   : > { %s631_s29 = sshll.u32 %s629_s19, 4  ;;  %s680_s14 = scalar_lea.hbm %s3570_s15, %s2766_s18  ;;  %s632_s29 = int_to_ptr.hbm [resolvable:$true] %s631_s29 }
  0x4c   : > { %2379 = dma.hbm_to_vmem [thread:$0]  (!%p2377_p2), %s548_s17, 128, %s550_s23, %s538_s3  }
  0x4d   : > { %2385 = dma.hbm_to_vmem [thread:$0]  (!%p2971_p9), %s632_s29, 16, %s634_s6, %s2977_s13  }
  0x4e   : > { %s677_s22 = scalar_lea.vmem [#allocation8], %s2962_s24  ;;  %s682_s27 = sshll.u32 %s680_s14, 4  ;;  %s683_s27 = int_to_ptr.hbm [resolvable:$true] %s682_s27 }
  0x4f   : > { %s684_s21 = sshll.u32 %s677_s22, 4  ;;  %699 = sbr.rel (%p2982_p12) target bundleno = 2021 (0x7e5), region = 88  ;;  %s685_s21 = int_to_ptr.vmem [resolvable:$true] %s684_s21 }
  0x50   : > { %2388 = dma.hbm_to_vmem [thread:$0]  (!%p2971_p9), %s683_s27, 16, %s685_s21, %s675_s10  }
  0x54   : > { %s3052_s26 = sand.u32 1, %s2750_s28  }
  0x55   : > { %s3520_s29 = sshll.u32 %s3052_s26, 3  ;;  %s702_s19 = scalar_lea.sflag [#allocation3], %s3052_s26 }
  0x56   : > { %s3058_s13 = scalar_lea.vmem [#allocation2], %s3520_s29 }
  0x57   : > { %2717 = dma.done.wait (%p3007_p10), %s702_s19, 128  }
  0x58   : > { %2719 = vsyncadd (%p3007_p10), %s702_s19, 4294967168  ;;  %s711_s16 = sand.u32 1, %s2929_s20   ;;  %s3066_s27 = sand.u32 1, %s2738_s25  }
  0x59   : > { %s712_s24 = scalar_lea.sflag [#allocation6], %s711_s16 }
  0x5a   : > { %2721 = dma.done.wait (%p2952_p7), %s712_s24, 32  }
  0x5b   : > { %2723 = vsyncadd (%p2952_p7), %s712_s24, 4294967264  ;;  %s730_s11 = scalar_lea.sflag [#allocation9], %s3066_s27 }
  0x5c   : > { %2725 = dma.done.wait (%p2952_p7), %s730_s11, 16  }
  0x5d   : > { %2727 = vsyncadd (%p2952_p7), %s730_s11, 4294967280  ;;  %p847_p8 = scmp.lt.s32.totalorder %s2758_s0, 1  ;;  %s3571_s8 = sld [smem:[#allocation32_spill]] }
  0x5e   : > { %s3572_s10 = sld [smem:[#allocation34_spill]]  ;;  %p2252_p7 = scmp.ne.s32.totalorder %s2758_s0, 0 }
  0x5f   : > { %s3082_s20 = scalar_select %p847_p8, %s2758_s0, 1 }
  0x60   : > { %s3573_s11 = sld [smem:[#allocation35_spill]] }
  0x61   : > { %s2342_s2 = sshll.u32 %s3082_s20, 4  ;;  %s3575_s6 = sld [smem:[#allocation37_spill]] }
  0x62   : > { %s3580_s17 = sld [smem:[#allocation42_spill]]  ;;  %s2347_s15 = sshll.u32 %s3082_s20, 6 }
  0x63   : > { %s851_s14 = scalar_lea.vmem %s3571_s8, %s2342_s2  ;;  %s3577_s8 = sld [smem:[#allocation38_spill]] }
  0x64   : > { %s856_s19 = scalar_lea.vmem %s3572_s10, %s2342_s2  ;;  %s3581_s1 = sld [smem:[#allocation43_spill]] }
  0x65   : > { %s3583_s28 = sld [smem:[#allocation46_spill]] }
  0x66   : > { %s3098_s23 = scalar_lea.vmem %s3573_s11, %s2342_s2  ;;  %s3579_s11 = sld [smem:[#allocation41_spill]] }
  0x67   : > { %s3107_s30 = scalar_lea.vmem %s3575_s6, %s2342_s2 }
  0x68   : > { %3576 = sst [smem:[#allocation30_spill]] %s3107_s30  ;;  %s886_s9 = scalar_lea.vmem %s3580_s17, %s3082_s20 }
  0x69   : > { %s875_s18 = scalar_lea.vmem %s3577_s8, %s3082_s20  ;;  %s3582_s8 = sld [smem:[#allocation44_spill]] }
  0x6a   : > { %s3130_s30 = scalar_lea.vmem %s3581_s1, %s2347_s15 }
  0x6b   : > { %s897_s16 = scalar_lea.vmem %s3583_s28, %s3082_s20  ;;  %902 = sbr.rel (%p2252_p7) target bundleno = 114 (0x72), region = 108 }
  0x6c   : > { %s3120_s25 = scalar_lea.vmem %s3579_s11, %s2342_s2  ;;  %s3584_s2 = sshll.u32 %s3052_s26, 3 }
  0x6d   : > { %s3142_s24 = scalar_lea.vmem [#allocation10], %s3584_s2 }
  0x6f   : > { %s894_s22 = scalar_lea.vmem %s3582_s8, %s3082_s20 }
  0x70   : > { %v903_v0 = vld [vmem:[%s3058_s13] sm:$0xff]  ;;  %vm904_vm0 = vcmask 261120  }
  0x71   : > { %905 = vst.msk [vmem:[%s3142_s24] sm:$0xff] %vm904_vm0, %v903_v0 }
  0x72 PF: > { %v2349_v1 = vld [vmem:[%s851_s14 + $0x8] sm:$0xff]  ;;  %v2348_v3 = vld [vmem:[%s851_s14] sm:$0xff]  ;;  %vm928_vm1 = vcmask 261120   ;;  %s3585_s28 = scalar_lea.vmem [#allocation5], %s3066_s27  ;;  %s3586_s13 = scalar_lea.vmem %s3496_s4, %s3082_s20  ;;  %v2779_v19 = vmov 1983009808  }
  0x73   : > { %v2351_v2 = vld [vmem:[%s856_s19 + $0x8] sm:$0xff]  ;;  %v2350_v4 = vld [vmem:[%s856_s19] sm:$0xff]  ;;  %938 = vmatpush.bf16.msra.mxu0 %v2349_v1  ;;  %s2776_s14 = smov 112   ;;  %s2777_s19 = smov 104   ;;  %v1028_v20 = vunpack.c.l.s4 %v2779_v19  ;;  %vm1023_vm2 = vcmask 1047556   ;;  %vm1385_vm3 = vcmask 64512  }
  0x74   : > { %971 = vmatpush.bf16.msra.mxu2 %v2351_v2  ;;  %v2492_v7 = vld [vmem:[%s3585_s28] ss:$0 sm:$0xff]  ;;  %s2778_s11 = smov 120   ;;  %v2353_v16 = vld [vmem:[%s3098_s23 + $0x8] sm:$0xff]  ;;  %v2780_v32 = vmov 1934713408  }
  0x75   : > { %v2493_v11 = vld [vmem:[%s3586_s13] ss:$0 sm:$0xff]  ;;  %v3171_v28 = vunpack.c.0.s8 %v1028_v20  ;;  %v1052_v33 = vunpack.c.l.s4 %v2780_v32  ;;  %s3587_s29 = sld [smem:[#allocation36_spill]]  ;;  %vm1513_vm4 = vcmask 1043456   ;;  %s2781_s5 = smov 24   ;;  %vm1710_vm5 = vcmask 130048  }
  0x76   : > { %v2352_v17 = vld [vmem:[%s3098_s23] sm:$0xff]  ;;  %s3589_s15 = sld [smem:[#allocation30_spill]]  ;;  %s2782_s6 = smov 16   ;;  %vm1712_vm6 = vcmask 195584  }
  0x77   : > { %939 = vmatpush.bf16.msra.mxu0 %v2348_v3  ;;  %v3180_v41 = vunpack.c.0.s8 %v1052_v33  ;;  %s2783_s3 = smov 8   ;;  %s3592_s2 = sld [smem:[#allocation40_spill]] }
  0x78   : > { %v3148_v5 = vld [vmem:[%s3142_s24] sm:$0xff]  ;;  %972 = vmatpush.bf16.msra.mxu2 %v2350_v4  ;;  %s1958_s8 = sshll.u32 %s3142_s24, 4  ;;  %s1959_s8 = int_to_ptr.vmem [resolvable:$true] %s1958_s8 }
  0x79   : > { %v907_v6 = vpack.c.bf16 %v3148_v5, %v3148_v5 }
  0x7b   : > { %2261 = vmatmul.msk.bf16.vlgmr.msra.gmra.mxu0 %vm928_vm1, %v907_v6  ;;  %2270 = vmatmul.msk.bf16.vlgmr.msra.gmra.mxu2 %vm928_vm1, %v907_v6  ;;  %s3588_s17 = scalar_lea.vmem %s3587_s29, %s3082_s20  ;;  %s3598_s29 = sld [smem:[#allocation47_spill]] }
  0x7c   : > { %1004 = vmatpush.bf16.msrb.mxu2 %v2353_v16 }
  0x7d   : > { %s3593_s28 = scalar_lea.vmem %s3592_s2, %s3082_s20 }
  0x80   : > { %1005 = vmatpush.bf16.msrb.mxu2 %v2352_v17 }
  0x8b   : > { %2279 = vmatmul.msk.bf16.vlgmr.msrb.gmra.mxu2 %vm928_vm1, %v907_v6 }
  0xf8   : > { %v941_v8 = vpop.f32.mrf.mxu0 }
  0xf9   : > { %v942_v9 = vadd.f32 %v2492_v7, %v941_v8 }
  0xfb   : > { %v1011_v10 = vmul.f32 0.35355338, %v942_v9 }
  0xfd   : > { %1016 = vrot.lane.b32.xlu2 %v1011_v10, %s2776_s14  ;;  %v1025_v26 = vrot.slane %v1011_v10, 4 }
  0xfe   : > { %v974_v12 = vpop.f32.mrf.mxu2 }
  0xff   : > { %v975_v13 = vadd.f32 %v2493_v11, %v974_v12 }
 0x100   : > { %v943_v14 = vpop.f32.mrf.mxu0 }
 0x101   : > { %1144 = vrot.lane.b32.xlu1 %v975_v13, %s2777_s19  ;;  %1138 = vrot.lane.b32.xlu0 %v975_v13, %s2778_s11  ;;  %v1149_v39 = vrot.slane %v975_v13, 4 }
 0x105   : > { %1019 = vrot.lane.b32.xlu2 %v1011_v10, %s2777_s19 }
 0x106   : > { %v976_v15 = vpop.f32.mrf.mxu2 }
 0x109   : > { %1141 = vrot.lane.b32.xlu0 %v975_v13, %s2776_s14  ;;  %1013 = vrot.lane.b32.xlu1 %v1011_v10, %s2778_s11 }
 0x157   : > { %v1017_v18 = vpop.permute.xlu2 %1016 }
 0x158   : > { %v1022_v21 = vrot.slane %v1017_v18, 4  ;;  %v1026_v34 = vsel %vm1023_vm2, %v1017_v18, %v1025_v26 }
 0x159   : > { %v1034_v40 = vperm.slane %v1026_v34, %v3171_v28 }
 0x15a   : > { %v1024_v29 = vsel %vm1023_vm2, %v1022_v21, %v1011_v10 }
 0x15b   : > { %v1030_v36 = vperm.slane %v1024_v29, %v3171_v28  ;;  %v1061_v59 = vrot.slane %v1034_v40, 4 }
 0x15d   : > { %v1049_v51 = vrot.slane %v1030_v36, 4 }
 0x15f   : > { %v1020_v31 = vpop.permute.xlu2 %1019 }
 0x160   : > { %v1035_v38 = vrot.slane %v1020_v31, 4 }
 0x173   : > { %v1145_v22 = vpop.permute.xlu1 %1144  ;;  %v1139_v23 = vpop.permute.xlu0 %1138 }
 0x174   : > { %v1159_v24 = vrot.slane %v1145_v22, 4  ;;  %v1161_v25 = vrot.slane %v1139_v23, 4 }
 0x176   : > { %v1162_v27 = vsel %vm1023_vm2, %v1145_v22, %v1161_v25  ;;  %v1160_v30 = vsel %vm1023_vm2, %v1159_v24, %v1139_v23 }
 0x177   : > { %v1170_v35 = vperm.slane %v1162_v27, %v3171_v28  ;;  %v1166_v37 = vperm.slane %v1160_v30, %v3171_v28 }
 0x179   : > { %v1183_v48 = vrot.slane %v1170_v35, 4  ;;  %v1171_v52 = vrot.slane %v1166_v37, 4 }
 0x17b   : > { %v1142_v42 = vpop.permute.xlu0 %1141  ;;  %v1014_v43 = vpop.permute.xlu1 %1013 }
 0x17c   : > { %v1147_v44 = vrot.slane %v1142_v42, 4  ;;  %v1150_v45 = vsel %vm1023_vm2, %v1142_v42, %v1149_v39  ;;  %v1036_v46 = vsel %vm1023_vm2, %v1035_v38, %v1014_v43  ;;  %v1037_v47 = vrot.slane %v1014_v43, 4 }
 0x17d   : > { %v1158_v49 = vperm.slane %v1150_v45, %v3171_v28  ;;  %v1042_v50 = vperm.slane %v1036_v46, %v3171_v28 }
 0x17e   : > { %v1148_v53 = vsel %vm1023_vm2, %v1147_v44, %v975_v13  ;;  %v1038_v54 = vsel %vm1023_vm2, %v1020_v31, %v1037_v47 }
 0x17f   : > { %v1154_v55 = vperm.slane %v1148_v53, %v3171_v28  ;;  %v1184_v56 = vsel %vm1023_vm2, %v1183_v48, %v1158_v49  ;;  %v1185_v57 = vrot.slane %v1158_v49, 4  ;;  %v1046_v58 = vperm.slane %v1038_v54, %v3171_v28 }
 0x180   : > { %v1190_v60 = vperm.slane %v1184_v56, %v3180_v41  ;;  %v1047_v61 = vrot.slane %v1042_v50, 4  ;;  %v1050_v62 = vsel %vm1023_vm2, %v1042_v50, %v1049_v51 }
 0x181   : > { %v1172_v63 = vsel %vm1023_vm2, %v1171_v52, %v1154_v55  ;;  %v1173_v0 = vrot.slane %v1154_v55, 4  ;;  %v1186_v1 = vsel %vm1023_vm2, %v1170_v35, %v1185_v57  ;;  %v1058_v2 = vperm.slane %v1050_v62, %v3180_v41 }
 0x182   : > { %v1178_v3 = vperm.slane %v1172_v63, %v3180_v41  ;;  %v1194_v4 = vperm.slane %v1186_v1, %v3180_v41  ;;  %v1199_v6 = vrot.slane %v1190_v60, 4  ;;  %v1048_v7 = vsel %vm1023_vm2, %v1047_v61, %v1030_v36 }
 0x183   : > { %v1174_v8 = vsel %vm1023_vm2, %v1166_v37, %v1173_v0  ;;  %v1054_v9 = vperm.slane %v1048_v7, %v3180_v41  ;;  %v1059_v10 = vrot.slane %v1046_v58, 4  ;;  %v1062_v11 = vsel %vm1023_vm2, %v1046_v58, %v1061_v59 }
 0x184   : > { %v1182_v12 = vperm.slane %v1174_v8, %v3180_v41  ;;  %v1195_v13 = vrot.slane %v1178_v3, 4  ;;  %v1200_v14 = vsel %vm1023_vm2, 0.0, %v1199_v6  ;;  %v1201_v15 = vrot.slane %v1194_v4, 4 }
 0x185   : > { %v1060_v16 = vsel %vm1023_vm2, %v1059_v10, %v1034_v40  ;;  %v1070_v17 = vperm.slane %v1062_v11, %v3180_v41  ;;  %v1071_v18 = vrot.slane %v1054_v9, 4  ;;  %v1073_v19 = vrot.slane %v1058_v2, 4 }
 0x186   : > { %v1197_v20 = vrot.slane %v1182_v12, 4  ;;  %v1202_v21 = vsel %vm1023_vm2, 0.0, %v1201_v15  ;;  %v1214_v22 = vsel %vm1023_vm2, %v1201_v15, %v1190_v60  ;;  %v1066_v23 = vperm.slane %v1060_v16, %v3180_v41 }
 0x187   : > { %v1218_v24 = vperm.slane %v1214_v22, %v3171_v28  ;;  %v1219_v25 = vrot.slane %v1202_v21, 4  ;;  %v1072_v26 = vsel %vm1023_vm2, 0.0, %v1071_v18  ;;  %v1074_v27 = vsel %vm1023_vm2, 0.0, %v1073_v19 }
 0x188   : > { %v1198_v29 = vsel %vm1023_vm2, 0.0, %v1197_v20  ;;  %v1075_v30 = vrot.slane %v1066_v23, 4  ;;  %v1077_v31 = vrot.slane %v1070_v17, 4  ;;  %v1079_v32 = vsel %vm1023_vm2, %v1073_v19, %v1054_v9 }
 0x189   : > { %v1220_v33 = vsel %vm1023_vm2, %v1219_v25, %v1200_v14  ;;  %v1083_v34 = vperm.slane %v1079_v32, %v3171_v28  ;;  %v1084_v35 = vrot.slane %v1074_v27, 4  ;;  %v1196_v36 = vsel %vm1023_vm2, 0.0, %v1195_v13 }
 0x18a   : > { %v1076_v37 = vsel %vm1023_vm2, 0.0, %v1075_v30  ;;  %v1078_v38 = vsel %vm1023_vm2, 0.0, %v1077_v31  ;;  %v1090_v39 = vsel %vm1023_vm2, %v1077_v31, %v1066_v23  ;;  %v1203_v40 = vsel %vm1023_vm2, %v1197_v20, %v1178_v3 }
 0x18b   : > { %v1095_v42 = vrot.slane %v1078_v38, 4  ;;  %v1207_v43 = vperm.slane %v1203_v40, %v3171_v28  ;;  %v1208_v44 = vrot.slane %v1198_v29, 4  ;;  %v1224_v45 = vperm.slane %v1220_v33, %v3171_v28 }
 0x18c   : > { %v1239_v46 = vrot.slane %v1218_v24, 4  ;;  %v1085_v47 = vsel %vm1023_vm2, %v1084_v35, %v1072_v26  ;;  %v1094_v48 = vperm.slane %v1090_v39, %v3171_v28  ;;  %v1103_v49 = vrot.slane %v1083_v34, 4 }
 0x18d   : > { %v1209_v50 = vsel %vm1023_vm2, %v1208_v44, %v1196_v36  ;;  %v1227_v51 = vrot.slane %v1207_v43, 4  ;;  %v1237_v52 = vrot.slane %v1224_v45, 4  ;;  %v1089_v53 = vperm.slane %v1085_v47, %v3171_v28  ;;  %v1007_v44 = vpop.f32.mrf.mxu2 }
 0x18e   : > { %v1213_v54 = vperm.slane %v1209_v50, %v3171_v28  ;;  %v1240_v55 = vsel %vm1023_vm2, %v1224_v45, %v1239_v46  ;;  %v1096_v56 = vsel %vm1023_vm2, %v1095_v42, %v1076_v37  ;;  %v1115_v57 = vrot.slane %v1094_v48, 4 }
 0x18f   : > { %v1248_v58 = vperm.slane %v1240_v55, %v3180_v41  ;;  %v1238_v59 = vsel %vm1023_vm2, %v1237_v52, %v1218_v24  ;;  %v1100_v60 = vperm.slane %v1096_v56, %v3171_v28  ;;  %v1104_v61 = vsel %vm1023_vm2, %v1089_v53, %v1103_v49 }
 0x190   : > { %v1228_v62 = vsel %vm1023_vm2, %v1213_v54, %v1227_v51  ;;  %v1225_v63 = vrot.slane %v1213_v54, 4  ;;  %v1244_v0 = vperm.slane %v1238_v59, %v3180_v41  ;;  %v1101_v4 = vrot.slane %v1089_v53, 4 }
 0x191   : > { %v1236_v1 = vperm.slane %v1228_v62, %v3180_v41  ;;  %v1253_v2 = vrot.slane %v1248_v58, 4  ;;  %v1116_v3 = vsel %vm1023_vm2, %v1100_v60, %v1115_v57  ;;  %v1112_v8 = vperm.slane %v1104_v61, %v3180_v41 }
 0x192   : > { %v1226_v6 = vsel %vm1023_vm2, %v1225_v63, %v1207_v43  ;;  %v1249_v7 = vrot.slane %v1244_v0, 4  ;;  %v1124_v9 = vperm.slane %v1116_v3, %v3180_v41  ;;  %v1102_v13 = vsel %vm1023_vm2, %v1101_v4, %v1083_v34 }
 0x193   : > { %v1254_v10 = vsel %vm1023_vm2, %v1253_v2, %v1236_v1  ;;  %v1255_v11 = vrot.slane %v1236_v1, 4  ;;  %v1232_v12 = vperm.slane %v1226_v6, %v3180_v41  ;;  %v1113_v16 = vrot.slane %v1100_v60, 4 }
 0x194   : > { %v1259_v14 = vpack.c.bf16 %v1254_v10, %v1254_v10  ;;  %v1129_v15 = vrot.slane %v1124_v9, 4  ;;  %v1108_v20 = vperm.slane %v1102_v13, %v3180_v41  ;;  %v1131_v25 = vrot.slane %v1112_v8, 4 }
 0x195   : > { %v1250_v17 = vsel %vm1023_vm2, %v1249_v7, %v1232_v12  ;;  %v1256_v18 = vsel %vm1023_vm2, %v1248_v58, %v1255_v11  ;;  %v1251_v19 = vrot.slane %v1232_v12, 4  ;;  %v1114_v26 = vsel %vm1023_vm2, %v1113_v16, %v1094_v48  ;;  %v1009_v45 = vpop.f32.mrf.mxu2  ;;  %v2494_v58 = vld [vmem:[%s3588_s17] ss:$0 sm:$0xff]  ;;  %s3599_s17 = smov %s3598_s29 }
 0x196   : > { %v1428_v21 = vsel %vm1385_vm3, %v1259_v14, 0  ;;  %v1257_v22 = vpack.c.bf16 %v1250_v17, %v1250_v17  ;;  %v1260_v23 = vpack.c.bf16 %v1256_v18, %v1256_v18  ;;  %v1120_v31 = vperm.slane %v1114_v26, %v3180_v41  ;;  %s2664_s20 = scalar_lea.hbm %s3599_s17, 16 }
 0x197   : > { %1437 = vmatpush.bf16.xpose.msra.mxu1 %v1428_v21  ;;  %v1252_v24 = vsel %vm1023_vm2, %v1244_v0, %v1251_v19  ;;  %v1130_v32 = vsel %vm1023_vm2, %v1129_v15, %v1112_v8  ;;  %v1127_v33 = vrot.slane %v1108_v20, 4  ;;  %v1132_v36 = vsel %vm1023_vm2, %v1124_v9, %v1131_v25 }
 0x198   : > { %v1390_v27 = vsel %vm1385_vm3, %v1257_v22, 0  ;;  %v1447_v29 = vsel %vm1385_vm3, %v1260_v23, 0  ;;  %v1258_v30 = vpack.c.bf16 %v1252_v24, %v1252_v24  ;;  %v1125_v35 = vrot.slane %v1120_v31, 4 }
 0x199   : > { %1399 = vmatpush.bf16.xpose.msra.mxu3 %v1390_v27  ;;  %1456 = vmatpush.bf16.xpose.msra.mxu2 %v1447_v29  ;;  %v1135_v37 = vpack.c.bf16 %v1130_v32, %v1130_v32  ;;  %v1128_v39 = vsel %vm1023_vm2, %v1120_v31, %v1127_v33  ;;  %v1136_v42 = vpack.c.bf16 %v1132_v36, %v1132_v36 }
 0x19a   : > { %v1409_v34 = vsel %vm1385_vm3, %v1258_v30, 0  ;;  %v1126_v38 = vsel %vm1023_vm2, %v1125_v35, %v1108_v20  ;;  %v1134_v43 = vpack.c.bf16 %v1128_v39, %v1128_v39  ;;  %v1008_v59 = vadd.f32 %v2494_v58, %v1007_v44 }
 0x19b   : > { %1418 = vmatpush.bf16.xpose.msrb.mxu0 %v1409_v34  ;;  %v1133_v40 = vpack.c.bf16 %v1126_v38, %v1126_v38 }
 0x19c   : > { %v1273_v24 = vrot.slane %v1008_v59, 4 }
 0x19e   : > { %2282 = vmatmul.msk.bf16.vlgmr.msra.gmra.mxu1 %vm1385_vm3, %v1135_v37 }
 0x1a0   : > { %2280 = vmatmul.msk.bf16.vlgmr.msra.gmra.mxu3 %vm1385_vm3, %v1133_v40  ;;  %2283 = vmatmul.msk.bf16.vlgmr.msra.gmra.mxu2 %vm1385_vm3, %v1136_v42 }
 0x1a2   : > { %2281 = vmatmul.msk.bf16.vlgmr.msrb.gmra.mxu0 %vm1385_vm3, %v1134_v43 }
 0x21b   : > { %v1439_v46 = vpop.f32.mrf.mxu1 }
 0x21c   : > { %v1468_v47 = vsel %vm1385_vm3, %v1439_v46, -inf }
 0x21d   : > { %1469 = vmax.xlane.f32.xlu2 %v1468_v47 }
 0x21f   : > { %v1420_v48 = vpop.f32.mrf.mxu0 }
 0x220   : > { %v1465_v52 = vsel %vm1385_vm3, %v1420_v48, -inf }
 0x223   : > { %v1401_v49 = vpop.f32.mrf.mxu3  ;;  %v1441_v50 = vpop.f32.mrf.mxu1 }
 0x224   : > { %v1458_v51 = vpop.f32.mrf.mxu2  ;;  %v1462_v53 = vsel %vm1385_vm3, %v1401_v49, -inf }
 0x225   : > { %v1471_v54 = vsel %vm1385_vm3, %v1458_v51, -inf  ;;  %1466 = vmax.xlane.f32.xlu2 %v1465_v52  ;;  %1463 = vmax.xlane.f32.xlu0 %v1462_v53 }
 0x226   : > { %1472 = vmax.xlane.f32.xlu1 %v1471_v54 }
 0x227   : > { %v1422_v55 = vpop.f32.mrf.mxu0 }
 0x22b   : > { %v1403_v56 = vpop.f32.mrf.mxu3 }
 0x22c   : > { %v1460_v57 = vpop.f32.mrf.mxu2 }
 0x239   : > { %1262 = vrot.lane.b32.xlu0 %v1008_v59, %s2778_s11 }
 0x23d   : > { %1268 = vrot.lane.b32.xlu2 %v1008_v59, %s2777_s19 }
 0x23f   : > { %1265 = vrot.lane.b32.xlu1 %v1008_v59, %s2776_s14 }
 0x290   : > { %v1470_v60 = vpop.xlane.xlu2 %1469 }
 0x291   : > { %v1476_v61 = vsub.f32 %v1439_v46, %v1470_v60 }
 0x293   : > { %v1482_v62 = vmul.f32 1.442695, %v1476_v61 }
 0x295   : > { %2502 = vpow2.f32 %v1482_v62 }
 0x298   : > { %v1464_v63 = vpop.xlane.xlu0 %1463  ;;  %v1467_v3 = vpop.xlane.xlu2 %1466 }
 0x299   : > { %v1473_v0 = vpop.xlane.xlu1 %1472  ;;  %v1474_v1 = vsub.f32 %v1401_v49, %v1464_v63  ;;  %v1475_v9 = vsub.f32 %v1420_v48, %v1467_v3 }
 0x29a   : > { %v1477_v2 = vsub.f32 %v1458_v51, %v1473_v0 }
 0x29b   : > { %v3274_v4 = vpop.eup %2502  ;;  %v1478_v6 = vmul.f32 1.442695, %v1474_v1  ;;  %v1480_v10 = vmul.f32 1.442695, %v1475_v9 }
 0x29c   : > { %v1484_v7 = vmul.f32 1.442695, %v1477_v2  ;;  %v1492_v8 = vsel %vm1385_vm3, %v3274_v4, 0.0 }
 0x29d   : > { %1493 = vadd.xlane.f32.xlu2 %v1492_v8 }
 0x29e   : > { %2504 = vpow2.f32 %v1484_v7 }
 0x29f   : > { %2506 = vpow2.f32 %v1478_v6 }
 0x2a0   : > { %2508 = vpow2.f32 %v1480_v10  ;;  %v1269_v15 = vpop.permute.xlu2 %1268 }
 0x2a1   : > { %v1283_v18 = vrot.slane %v1269_v15, 4 }
 0x2a4   : > { %v3278_v11 = vpop.eup %2504 }
 0x2a5   : > { %v3280_v12 = vpop.eup %2506  ;;  %v1495_v13 = vsel %vm1385_vm3, %v3278_v11, 0.0 }
 0x2a6   : > { %1496 = vadd.xlane.f32.xlu1 %v1495_v13  ;;  %v1486_v14 = vsel %vm1385_vm3, %v3280_v12, 0.0  ;;  %v3286_v16 = vpop.eup %2508 }
 0x2a7   : > { %1487 = vadd.xlane.f32.xlu0 %v1486_v14  ;;  %v1489_v22 = vsel %vm1385_vm3, %v3286_v16, 0.0 }
 0x2ab   : > { %v1263_v17 = vpop.permute.xlu0 %1262 }
 0x2ac   : > { %v1285_v19 = vrot.slane %v1263_v17, 4  ;;  %v1284_v20 = vsel %vm1023_vm2, %v1283_v18, %v1263_v17 }
 0x2ad   : > { %v1290_v25 = vperm.slane %v1284_v20, %v3171_v28 }
 0x2ae   : > { %v1286_v21 = vsel %vm1023_vm2, %v1269_v15, %v1285_v19 }
 0x2af   : > { %v1294_v23 = vperm.slane %v1286_v21, %v3171_v28  ;;  %1490 = vadd.xlane.f32.xlu0 %v1489_v22  ;;  %v1295_v33 = vrot.slane %v1290_v25, 4 }
 0x2b1   : > { %v1307_v26 = vrot.slane %v1294_v23, 4  ;;  %v1266_v27 = vpop.permute.xlu1 %1265 }
 0x2b2   : > { %v1271_v29 = vrot.slane %v1266_v27, 4  ;;  %v1274_v30 = vsel %vm1023_vm2, %v1266_v27, %v1273_v24 }
 0x2b3   : > { %v1282_v31 = vperm.slane %v1274_v30, %v3171_v28 }
 0x2b4   : > { %v1272_v32 = vsel %vm1023_vm2, %v1271_v29, %v1008_v59 }
 0x2b5   : > { %v1278_v34 = vperm.slane %v1272_v32, %v3171_v28  ;;  %v1308_v35 = vsel %vm1023_vm2, %v1307_v26, %v1282_v31  ;;  %v1309_v36 = vrot.slane %v1282_v31, 4 }
 0x2b6   : > { %v1314_v37 = vperm.slane %v1308_v35, %v3180_v41 }
 0x2b7   : > { %v1296_v38 = vsel %vm1023_vm2, %v1295_v33, %v1278_v34  ;;  %v1297_v39 = vrot.slane %v1278_v34, 4  ;;  %v1310_v40 = vsel %vm1023_vm2, %v1294_v23, %v1309_v36 }
 0x2b8   : > { %v1302_v42 = vperm.slane %v1296_v38, %v3180_v41  ;;  %v1318_v43 = vperm.slane %v1310_v40, %v3180_v41  ;;  %v1323_v46 = vrot.slane %v1314_v37, 4 }
 0x2b9   : > { %v1298_v44 = vsel %vm1023_vm2, %v1290_v25, %v1297_v39 }
 0x2ba   : > { %v1306_v45 = vperm.slane %v1298_v44, %v3180_v41  ;;  %v1325_v47 = vrot.slane %v1318_v43, 4  ;;  %v1319_v48 = vrot.slane %v1302_v42, 4  ;;  %v1324_v55 = vsel %vm1023_vm2, 0.0, %v1323_v46 }
 0x2bc   : > { %v1321_v49 = vrot.slane %v1306_v45, 4  ;;  %v1326_v50 = vsel %vm1023_vm2, 0.0, %v1325_v47  ;;  %v1338_v51 = vsel %vm1023_vm2, %v1325_v47, %v1314_v37  ;;  %v1320_v61 = vsel %vm1023_vm2, 0.0, %v1319_v48 }
 0x2bd   : > { %v1342_v52 = vperm.slane %v1338_v51, %v3171_v28  ;;  %v1343_v53 = vrot.slane %v1326_v50, 4 }
 0x2be   : > { %v1322_v54 = vsel %vm1023_vm2, 0.0, %v1321_v49  ;;  %v1327_v56 = vsel %vm1023_vm2, %v1321_v49, %v1302_v42 }
 0x2bf   : > { %v1332_v57 = vrot.slane %v1322_v54, 4  ;;  %v1344_v58 = vsel %vm1023_vm2, %v1343_v53, %v1324_v55  ;;  %v1331_v59 = vperm.slane %v1327_v56, %v3171_v28  ;;  %v1363_v60 = vrot.slane %v1342_v52, 4 }
 0x2c0   : > { %v1348_v62 = vperm.slane %v1344_v58, %v3171_v28 }
 0x2c1   : > { %v1333_v63 = vsel %vm1023_vm2, %v1332_v57, %v1320_v61  ;;  %v1351_v0 = vrot.slane %v1331_v59, 4 }
 0x2c2   : > { %v1337_v1 = vperm.slane %v1333_v63, %v3171_v28  ;;  %v1364_v2 = vsel %vm1023_vm2, %v1348_v62, %v1363_v60  ;;  %v1361_v3 = vrot.slane %v1348_v62, 4 }
 0x2c3   : > { %v1372_v6 = vperm.slane %v1364_v2, %v3180_v41 }
 0x2c4   : > { %v1352_v7 = vsel %vm1023_vm2, %v1337_v1, %v1351_v0  ;;  %v1349_v8 = vrot.slane %v1337_v1, 4  ;;  %v1362_v9 = vsel %vm1023_vm2, %v1361_v3, %v1342_v52 }
 0x2c5   : > { %v1360_v10 = vperm.slane %v1352_v7, %v3180_v41  ;;  %v1377_v13 = vrot.slane %v1372_v6, 4  ;;  %v1368_v14 = vperm.slane %v1362_v9, %v3180_v41 }
 0x2c6   : > { %v1350_v15 = vsel %vm1023_vm2, %v1349_v8, %v1331_v59 }
 0x2c7   : > { %v1378_v17 = vsel %vm1023_vm2, %v1377_v13, %v1360_v10  ;;  %v1379_v18 = vrot.slane %v1360_v10, 4  ;;  %v1356_v19 = vperm.slane %v1350_v15, %v3180_v41  ;;  %v1373_v20 = vrot.slane %v1368_v14, 4 }
 0x2c8   : > { %v1383_v21 = vpack.c.bf16 %v1378_v17, %v1378_v17 }
 0x2c9   : > { %v1374_v22 = vsel %vm1023_vm2, %v1373_v20, %v1356_v19  ;;  %v1375_v23 = vrot.slane %v1356_v19, 4  ;;  %v1380_v24 = vsel %vm1023_vm2, %v1372_v6, %v1379_v18 }
 0x2ca   : > { %v1553_v25 = vsel %vm1513_vm4, %v1383_v21, 0  ;;  %v1381_v26 = vpack.c.bf16 %v1374_v22, %v1374_v22  ;;  %v1384_v27 = vpack.c.bf16 %v1380_v24, %v1380_v24 }
 0x2cb   : > { %1562 = vmatpush.bf16.msrb.mxu1 %v1553_v25  ;;  %v1376_v29 = vsel %vm1023_vm2, %v1368_v14, %v1375_v23 }
 0x2cc   : > { %v1515_v30 = vsel %vm1513_vm4, %v1381_v26, 0  ;;  %v1572_v31 = vsel %vm1513_vm4, %v1384_v27, 0  ;;  %v1382_v32 = vpack.c.bf16 %v1376_v29, %v1376_v29 }
 0x2cd   : > { %1524 = vmatpush.bf16.msrb.mxu3 %v1515_v30  ;;  %1581 = vmatpush.bf16.msrb.mxu2 %v1572_v31 }
 0x2ce   : > { %v1534_v33 = vsel %vm1513_vm4, %v1382_v32, 0 }
 0x2cf   : > { %1543 = vmatpush.bf16.msra.mxu0 %v1534_v33 }
 0x310   : > { %v1494_v34 = vpop.xlane.xlu2 %1493 }
 0x311   : > { %2510 = vrcp.f32 %v1494_v34 }
 0x317   : > { %v2511_v35 = vpop.eup %2510 }
 0x318   : > { %v1504_v36 = vmul.f32 %v2511_v35, %v3274_v4 }
 0x319   : > { %v1497_v37 = vpop.xlane.xlu1 %1496 }
 0x31a   : > { %2512 = vrcp.f32 %v1497_v37  ;;  %v1488_v38 = vpop.xlane.xlu0 %1487  ;;  %v1508_v39 = vpack.c.bf16 %v1504_v36, %v1504_v36 }
 0x31b   : > { %2514 = vrcp.f32 %v1488_v38 }
 0x31c   : > { %2286 = vmatmul.msk.bf16.vlgmr.msrb.gmra.mxu1 %vm1385_vm3, %v1508_v39 }
 0x320   : > { %v2513_v40 = vpop.eup %2512 }
 0x321   : > { %v2515_v42 = vpop.eup %2514  ;;  %v1505_v43 = vmul.f32 %v2513_v40, %v3278_v11 }
 0x322   : > { %v1502_v44 = vmul.f32 %v2515_v42, %v3280_v12  ;;  %v1491_v45 = vpop.xlane.xlu0 %1490 }
 0x323   : > { %v1509_v46 = vpack.c.bf16 %v1505_v43, %v1505_v43  ;;  %2516 = vrcp.f32 %v1491_v45 }
 0x324   : > { %v1506_v47 = vpack.c.bf16 %v1502_v44, %v1502_v44 }
 0x325   : > { %2287 = vmatmul.msk.bf16.vlgmr.msrb.gmra.mxu2 %vm1385_vm3, %v1509_v46 }
 0x326   : > { %2284 = vmatmul.msk.bf16.vlgmr.msrb.gmra.mxu3 %vm1385_vm3, %v1506_v47 }
 0x329   : > { %v2517_v4 = vpop.eup %2516 }
 0x32a   : > { %v1503_v48 = vmul.f32 %v2517_v4, %v3286_v16 }
 0x32c   : > { %v1507_v49 = vpack.c.bf16 %v1503_v48, %v1503_v48 }
 0x32e   : > { %2285 = vmatmul.msk.bf16.vlgmr.msra.gmra.mxu0 %vm1385_vm3, %v1507_v49 }
 0x399   : > { %v1564_v50 = vpop.f32.mrf.mxu1 }
 0x39a   : > { %v1587_v52 = vrot.slane %v1564_v50, 4 }
 0x3a1   : > { %v1566_v51 = vpop.f32.mrf.mxu1 }
 0x3a8   : > { %v1583_v11 = vpop.f32.mrf.mxu2 }
 0x3a9   : > { %v1526_v53 = vpop.f32.mrf.mxu3  ;;  %v1599_v12 = vrot.slane %v1583_v11, 4 }
 0x3aa   : > { %v1588_v54 = vsel %vm1023_vm2, %v1587_v52, %v1526_v53  ;;  %v1589_v55 = vrot.slane %v1526_v53, 4 }
 0x3ab   : > { %v1594_v56 = vperm.slane %v1588_v54, %v3171_v28  ;;  %v1545_v57 = vpop.f32.mrf.mxu0 }
 0x3ac   : > { %v1590_v58 = vsel %vm1023_vm2, %v1564_v50, %v1589_v55  ;;  %v1600_v59 = vsel %vm1023_vm2, %v1599_v12, %v1545_v57  ;;  %v1601_v16 = vrot.slane %v1545_v57, 4  ;;  %v2354_v57 = vld [vmem:[%s3589_s15] sm:$0xff] }
 0x3ad   : > { %v1598_v60 = vperm.slane %v1590_v58, %v3171_v28  ;;  %v1613_v61 = vrot.slane %v1594_v56, 4  ;;  %v1606_v62 = vperm.slane %v1600_v59, %v3171_v28 }
 0x3ae   : > { %v1602_v63 = vsel %vm1023_vm2, %v1583_v11, %v1601_v16 }
 0x3af   : > { %v1625_v0 = vrot.slane %v1598_v60, 4  ;;  %v1610_v1 = vperm.slane %v1602_v63, %v3171_v28  ;;  %v1611_v2 = vrot.slane %v1606_v62, 4  ;;  %v1614_v3 = vsel %vm1023_vm2, %v1606_v62, %v1613_v61  ;;  %v2495_v63 = vld [vmem:[%s875_s18] ss:$0 sm:$0xff] }
 0x3b0   : > { %v1622_v6 = vperm.slane %v1614_v3, %v3180_v41  ;;  %v1585_v7 = vpop.f32.mrf.mxu2 }
 0x3b1   : > { %v1612_v8 = vsel %vm1023_vm2, %v1611_v2, %v1594_v56  ;;  %v1623_v9 = vrot.slane %v1610_v1, 4  ;;  %v1626_v10 = vsel %vm1023_vm2, %v1610_v1, %v1625_v0  ;;  %v1528_v13 = vpop.f32.mrf.mxu3  ;;  %v2355_v56 = vld [vmem:[%s3589_s15 + $0x8] sm:$0xff]  ;;  %v2784_v7 = vmov 32.0  }
 0x3b2   : > { %v1618_v14 = vperm.slane %v1612_v8, %v3180_v41  ;;  %v1634_v15 = vperm.slane %v1626_v10, %v3180_v41  ;;  %v1637_v17 = vrot.slane %v1622_v6, 4  ;;  %1744 = vmatpush.bf16.msra.mxu3 %v2355_v56  ;;  %2518 = vrcp.f32 %v2784_v7 }
 0x3b3   : > { %v1624_v18 = vsel %vm1023_vm2, %v1623_v9, %v1598_v60  ;;  %v1547_v19 = vpop.f32.mrf.mxu0 }
 0x3b4   : > { %v1630_v20 = vperm.slane %v1624_v18, %v3180_v41  ;;  %v1635_v21 = vrot.slane %v1618_v14, 4  ;;  %v1638_v22 = vsel %vm1023_vm2, 0.0, %v1637_v17  ;;  %v1641_v23 = vrot.slane %v1634_v15, 4 }
 0x3b5   : > { %v1643_v24 = vsel %vm1023_vm2, %v1637_v17, %v1618_v14  ;;  %v1648_v25 = vrot.slane %v1638_v22, 4  ;;  %v2356_v22 = vld [vmem:[%s3120_s25] sm:$0xff] }
 0x3b6   : > { %v1636_v26 = vsel %vm1023_vm2, 0.0, %v1635_v21  ;;  %v1639_v27 = vrot.slane %v1630_v20, 4  ;;  %v1642_v29 = vsel %vm1023_vm2, 0.0, %v1641_v23  ;;  %v1647_v30 = vperm.slane %v1643_v24, %v3171_v28  ;;  %1745 = vmatpush.bf16.msra.mxu3 %v2354_v57  ;;  %v2357_v21 = vld [vmem:[%s3120_s25 + $0x8] sm:$0xff]  ;;  %s3591_s25 = scalar_lea.vmem [#allocation7], %s3066_s27 }
 0x3b7   : > { %v1659_v31 = vrot.slane %v1642_v29, 4  ;;  %v1649_v32 = vsel %vm1023_vm2, %v1648_v25, %v1636_v26  ;;  %v1654_v33 = vsel %vm1023_vm2, %v1641_v23, %v1630_v20  ;;  %1821 = vmatpush.bf16.msrb.mxu0 %v2357_v21  ;;  %v2365_v23 = vld [vmem:[%s3130_s30 + $0x38] sm:$0xff]  ;;  %v2364_v26 = vld [vmem:[%s3130_s30 + $0x30] sm:$0xff]  ;;  %v2363_v29 = vld [vmem:[%s3130_s30 + $0x28] sm:$0xff] }
 0x3b8   : > { %v1640_v34 = vsel %vm1023_vm2, 0.0, %v1639_v27  ;;  %v1653_v35 = vperm.slane %v1649_v32, %v3171_v28  ;;  %v1658_v36 = vperm.slane %v1654_v33, %v3171_v28  ;;  %v1667_v37 = vrot.slane %v1647_v30, 4  ;;  %v2519_v8 = vpop.eup %2518  ;;  %1898 = vmatpush.bf16.msra.mxu1 %v2365_v23  ;;  %v2361_v33 = vld [vmem:[%s3130_s30 + $0x18] sm:$0xff] }
 0x3b9   : > { %v1660_v38 = vsel %vm1023_vm2, %v1659_v31, %v1640_v34  ;;  %v1758_v9 = vmul.f32 32.0, %v2519_v8  ;;  %vm1762_vm7 = vweird.f32 %v2519_v8 }
 0x3ba   : > { %v1664_v39 = vperm.slane %v1660_v38, %v3171_v28  ;;  %v1668_v40 = vsel %vm1023_vm2, %v1653_v35, %v1667_v37  ;;  %v1679_v42 = vrot.slane %v1658_v36, 4  ;;  %v1665_v43 = vrot.slane %v1653_v35, 4 }
 0x3bb   : > { %v1676_v44 = vperm.slane %v1668_v40, %v3180_v41  ;;  %v1759_v10 = vsub.f32 1.0, %v1758_v9  ;;  %1822 = vmatpush.bf16.msrb.mxu0 %v2356_v22 }
 0x3bc   : > { %v1680_v45 = vsel %vm1023_vm2, %v1664_v39, %v1679_v42  ;;  %v1666_v46 = vsel %vm1023_vm2, %v1665_v43, %v1647_v30  ;;  %v1677_v47 = vrot.slane %v1664_v39, 4  ;;  %1899 = vmatpush.bf16.msra.mxu1 %v2364_v26  ;;  %v2362_v30 = vld [vmem:[%s3130_s30 + $0x20] sm:$0xff] }
 0x3bd   : > { %v1688_v4 = vperm.slane %v1680_v45, %v3180_v41  ;;  %v1695_v48 = vrot.slane %v1676_v44, 4  ;;  %v1672_v49 = vperm.slane %v1666_v46, %v3180_v41  ;;  %v1760_v13 = vmul.f32 %v2519_v8, %v1759_v10  ;;  %v2496_v39 = vld [vmem:[%s3591_s25] ss:$0 sm:$0xff] }
 0x3be   : > { %v1678_v50 = vsel %vm1023_vm2, %v1677_v47, %v1658_v36  ;;  %v2360_v36 = vld [vmem:[%s3130_s30 + $0x10] sm:$0xff]  ;;  %v2497_v42 = vld [vmem:[%s3593_s28] ss:$0 sm:$0xff]  ;;  %v2359_v47 = vld [vmem:[%s3130_s30 + $0x8] sm:$0xff] }
 0x3bf   : > { %v1696_v28 = vsel %vm1023_vm2, %v1688_v4, %v1695_v48  ;;  %v1693_v51 = vrot.slane %v1688_v4, 4  ;;  %v1684_v52 = vperm.slane %v1678_v50, %v3180_v41  ;;  %v1691_v11 = vrot.slane %v1672_v49, 4  ;;  %v2358_v4 = vld [vmem:[%s3130_s30] sm:$0xff] }
 0x3c0   : > { %1706 = vrot.lane.b32.xlu2 %v1696_v28, %s2781_s5  ;;  %v1761_v14 = vadd.f32 %v2519_v8, %v1760_v13  ;;  %1900 = vmatpush.bf16.msra.mxu1 %v2363_v29  ;;  %v2498_v48 = vld [vmem:[%s886_s9] ss:$0 sm:$0xff]  ;;  %s3596_s9 = sld [smem:[#allocation20_spill]] }
 0x3c1   : > { %v1694_v53 = vsel %vm1023_vm2, %v1693_v51, %v1676_v44  ;;  %v1689_v12 = vrot.slane %v1684_v52, 4  ;;  %v1692_v54 = vsel %vm1023_vm2, %v1684_v52, %v1691_v11  ;;  %v2499_v11 = vld [vmem:[%s894_s22] ss:$0 sm:$0xff]  ;;  %s3597_s22 = scalar_lea.vmem [#allocation8], %s3066_s27  ;;  %s1946_s27 = scalar_lea.sflag [#allocation4], %s3052_s26 }
 0x3c2   : > { %1702 = vrot.lane.b32.xlu0 %v1694_v53, %s2782_s6  ;;  %1698 = vrot.lane.b32.xlu1 %v1692_v54, %s2783_s3  ;;  %v3393_v15 = vsel %vm1762_vm7, %v2519_v8, %v1761_v14  ;;  %v2500_v7 = vld [vmem:[%s3597_s22] ss:$0 sm:$0xff] }
 0x3c3   : > { %v1690_v55 = vsel %vm1023_vm2, %v1689_v12, %v1672_v49  ;;  %v2501_v10 = vld [vmem:[%s897_s16] ss:$0 sm:$0xff] }
 0x3c4   : > { %1901 = vmatpush.bf16.msra.mxu1 %v2362_v30 }
 0x3c6   : > { %s2339_s30 = sshll.u32 %s3596_s9, 3 }
 0x3c7   : > { %s1956_s15 = scalar_lea.hbm %s3598_s29, %s2339_s30 }
 0x3c8   : > { %1902 = vmatpush.bf16.msra.mxu1 %v2361_v33  ;;  %s1960_s21 = sshll.u32 %s1956_s15, 4  ;;  %s1961_s21 = int_to_ptr.hbm [resolvable:$true] %s1960_s21 }
 0x3c9   : > { %s2658_s25 = sshra.s32 %s1961_s21, 4  ;;  %s2659_s25 = int_to_ptr.hbm [resolvable:$true] %s2658_s25 }
 0x3ca   : > { %s2660_s18 = scalar_lea.hbm %s2659_s25, 8  ;;  %p2665_p4 = scmp.lt.s32.totalorder %s2659_s25, %s3599_s17 }
 0x3cb   : > { %p2661_p9 = scmp.ne.s32.totalorder %s2659_s25, %s2660_s18  ;;  %p2666_p5 = scmp.lt.s32.totalorder %s2664_s20, %s2660_s18 }
 0x3cc   : > { %1903 = vmatpush.bf16.msra.mxu1 %v2360_v36 }
 0x3cd   : > { %p2662_p12 = pnand %p2661_p9, %p3011_p0  ;;  %p2667_p6 = por %p2666_p5, %p2665_p4 }
 0x3cf   : > { %p2663_p13 = pneg %p2662_p12 }
 0x3d0   : > { %1904 = vmatpush.bf16.msra.mxu1 %v2359_v47 }
 0x3d1   : > { %p2668_p10 = pnand %p2667_p6, %p2663_p13 }
 0x3d4   : > { %1905 = vmatpush.bf16.msra.mxu1 %v2358_v4 }
 0x41a   : > { %v1707_v16 = vpop.permute.xlu2 %1706 }
 0x434   : > { %v1703_v41 = vpop.permute.xlu0 %1702  ;;  %v1699_v58 = vpop.permute.xlu1 %1698 }
 0x435   : > { %v1709_v59 = vsel %vm1385_vm3, %v1690_v55, %v1699_v58 }
 0x436   : > { %v1711_v60 = vsel %vm1710_vm5, %v1709_v59, %v1703_v41 }
 0x437   : > { %v1713_v61 = vsel %vm1712_vm6, %v1711_v60, %v1707_v16 }
 0x438   : > { %v1714_v62 = vpack.c.bf16 %v1713_v61, %v1713_v61 }
 0x43a   : > { %2296 = vmatmul.msk.bf16.vlgmr.msra.gmra.mxu3 %vm928_vm1, %v1714_v62 }
 0x4bd   : > { %v1747_v0 = vpop.f32.mrf.mxu3 }
 0x4be   : > { %v1748_v1 = vadd.f32 %v2495_v63, %v1747_v0 }
 0x4c0   : > { %v1751_v2 = vadd.f32 %v1748_v1, %v3148_v5 }
 0x4c2   : > { %v1754_v3 = vsel %vm928_vm1, %v1751_v2, 0.0 }
 0x4c3   : > { %1755 = vadd.xlane.f32.xlu0 %v1754_v3 }
 0x4c5   : > { %v1749_v6 = vpop.f32.mrf.mxu3 }
 0x536   : > { %v1756_v17 = vpop.xlane.xlu0 %1755 }
 0x537   : > { %v1764_v5 = vmul.f32 %v3393_v15, %v1756_v17 }
 0x539   : > { %v1765_v18 = vsub.f32 %v1751_v2, %v1764_v5 }
 0x53b   : > { %v1766_v19 = vmul.f32 %v1765_v18, %v1765_v18 }
 0x53d   : > { %v1767_v20 = vsel %vm928_vm1, %v1766_v19, 0.0 }
 0x53e   : > { %1768 = vadd.xlane.f32.xlu1 %v1767_v20 }
 0x5b1   : > { %v1769_v24 = vpop.xlane.xlu1 %1768 }
 0x5b2   : > { %v1770_v25 = vmul.f32 %v1769_v24, %v3393_v15 }
 0x5b4   : > { %v1771_v27 = vadd.f32 1e-05, %v1770_v25 }
 0x5b6   : > { %2520 = vrsqrt.f32 %v1771_v27  ;;  %vm1778_vm9 = vweird.f32 %v1771_v27 }
 0x5bc   : > { %v2521_v31 = vpop.eup %2520 }
 0x5bd   : > { %v1773_v32 = vmul.f32 %v2521_v31, %v1771_v27  ;;  %vm1779_vm8 = vweird.f32 %v2521_v31 }
 0x5be   : > { %vm1780_vm10 = vmor %vm1778_vm9, %vm1779_vm8 }
 0x5bf   : > { %v1774_v34 = vmul.f32 %v2521_v31, %v1773_v32 }
 0x5c1   : > { %v1775_v35 = vmul.f32 0.5, %v1774_v34 }
 0x5c3   : > { %v1776_v37 = vsub.f32 1.5, %v1775_v35 }
 0x5c5   : > { %v1777_v38 = vmul.f32 %v2521_v31, %v1776_v37 }
 0x5c7   : > { %v1781_v40 = vsel %vm1780_vm10, %v2521_v31, %v1777_v38 }
 0x5c8   : > { %v1782_v43 = vmul.f32 %v1781_v40, %v1765_v18 }
 0x5ca   : > { %v1786_v44 = vmul.f32 %v2496_v39, %v1782_v43 }
 0x5cc   : > { %v1790_v45 = vadd.f32 %v2497_v42, %v1786_v44 }
 0x5ce   : > { %v1791_v46 = vpack.c.bf16 %v1790_v45, %v1790_v45 }
 0x5d0   : > { %2305 = vmatmul.msk.bf16.vlgmr.msrb.gmra.mxu0 %vm928_vm1, %v1791_v46 }
 0x64d   : > { %v1824_v49 = vpop.f32.mrf.mxu0 }
 0x64e   : > { %v1825_v50 = vadd.f32 %v2498_v48, %v1824_v49 }
 0x650   : > { %v1828_v28 = vmax.f32 %v1825_v50, 0.0 }
 0x652   : > { %v1829_v51 = vpack.c.bf16 %v1828_v28, %v1828_v28 }
 0x654   : > { %1906 = vmatmul.bf16.vlgmr.msra.gmra.mxu1 %v1829_v51 }
 0x655   : > { %v1826_v52 = vpop.f32.mrf.mxu0 }
 0x6d1   : > { %v1907_v53 = vpop.f32.mrf.mxu1 }
 0x6d2   : > { %v1908_v12 = vadd.f32 %v2499_v11, %v1907_v53 }
 0x6d4   : > { %v1911_v54 = vadd.f32 %v1908_v12, %v1790_v45 }
 0x6d6   : > { %v1914_v55 = vsel %vm928_vm1, %v1911_v54, 0.0 }
 0x6d7   : > { %1915 = vadd.xlane.f32.xlu2 %v1914_v55 }
 0x6d9   : > { %v1909_v56 = vpop.f32.mrf.mxu1 }
 0x74a   : > { %v1916_v57 = vpop.xlane.xlu2 %1915 }
 0x74b   : > { %v1917_v41 = vmul.f32 %v1916_v57, %v3393_v15 }
 0x74d   : > { %v1918_v58 = vsub.f32 %v1911_v54, %v1917_v41 }
 0x74f   : > { %v1919_v59 = vmul.f32 %v1918_v58, %v1918_v58 }
 0x751   : > { %v1920_v16 = vsel %vm928_vm1, %v1919_v59, 0.0 }
 0x752   : > { %1921 = vadd.xlane.f32.xlu0 %v1920_v16 }
 0x7c5   : > { %v1922_v60 = vpop.xlane.xlu0 %1921 }
 0x7c6   : > { %v1923_v61 = vmul.f32 %v1922_v60, %v3393_v15 }
 0x7c8   : > { %v1924_v62 = vadd.f32 1e-05, %v1923_v61 }
 0x7ca   : > { %2522 = vrsqrt.f32 %v1924_v62  ;;  %vm1931_vm12 = vweird.f32 %v1924_v62 }
 0x7d0   : > { %v2523_v63 = vpop.eup %2522 }
 0x7d1   : > { %v1926_v0 = vmul.f32 %v2523_v63, %v1924_v62  ;;  %vm1932_vm11 = vweird.f32 %v2523_v63 }
 0x7d2   : > { %vm1933_vm13 = vmor %vm1931_vm12, %vm1932_vm11 }
 0x7d3   : > { %v1927_v1 = vmul.f32 %v2523_v63, %v1926_v0 }
 0x7d5   : > { %v1928_v2 = vmul.f32 0.5, %v1927_v1 }
 0x7d7   : > { %v1929_v3 = vsub.f32 1.5, %v1928_v2 }
 0x7d9   : > { %v1930_v6 = vmul.f32 %v2523_v63, %v1929_v3 }
 0x7db   : > { %v1934_v8 = vsel %vm1933_vm13, %v2523_v63, %v1930_v6 }
 0x7dc   : > { %v1935_v9 = vmul.f32 %v1934_v8, %v1918_v58 }
 0x7de   : > { %v1939_v13 = vmul.f32 %v2500_v7, %v1935_v9 }
 0x7e0   : > { %v1943_v14 = vadd.f32 %v2501_v10, %v1939_v13 }
 0x7e2   : > { %1944 = vst.msk [vmem:[%s3142_s24] sm:$0xff] %vm928_vm1, %v1943_v14 }
 0x7e3   : > { %2671 = shalt.err (!%p2668_p10)
}
 0x7e4   : > { %2374 = dma.vmem_to_hbm [thread:$0]  (%p3011_p0), %s1959_s8, 128, %s1961_s21, %s1946_s27  }
 0x7e5 PF: > { %s3602_s26 = sld [smem:[#allocation23_spill]] }
 0x7e6   : > { %s3603_s24 = sld [smem:[#allocation17_spill]] }
 0x7eb   : > { %p2394_p1 = scmp.ge.s32.totalorder %s3602_s26, 2 }
 0x7ec   : > { %s1972_s1 = sand.u32 1, %s3603_s24  }
 0x7ed   : > { %p2390_p11 = pnand %p2394_p1, %p3018_p3  ;;  %s1973_s13 = scalar_lea.sflag [#allocation4], %s1972_s1 }
 0x7ef   : > { %p2391_p2 = pneg %p2390_p11 }
 0x7f1   : > { %2729 = dma.done.wait (%p2391_p2), %s1973_s13, 128  }
 0x7f2   : > { %2731 = vsyncadd (%p2391_p2), %s1973_s13, 4294967168  ;;  %s39_s1 = sadd.s32 1, %s3602_s26   ;;  %s3605_s24 = sld [smem:[#allocation15_spill]] }
 0x7f3   : > { %p36_p8 = scmp.ge.s32.totalorder %s39_s1, 6   ;;  %s3606_s25 = sld [smem:[#allocation16_spill]] }
 0x7f4   : > { %s3607_s26 = sld [smem:[#allocation25_spill]] }
 0x7f5   : > { %s3608_s27 = sld [smem:[#allocation18_spill]] }
 0x7f6   : > { %s3609_s28 = sld [smem:[#allocation19_spill]] }
 0x7f7   : > { %s3610_s29 = sld [smem:[#allocation29_spill]]  ;;  %38 = sbr.rel (!%p36_p8) target bundleno = 31 (0x1f), region = 213 }
 0x7f8   : > { %s3611_s0 = sld [smem:[#allocation21_spill]] }
 0x7f9   : > { %s3612_s30 = sld [smem:[#allocation22_spill]] }
 0x7fa   : > { %s3613_s18 = sld [smem:[#allocation24_spill]] }
 0x7fb   : > { %s3614_s19 = sld [smem:[#allocation26_spill]] }
 0x7fc   :  { %1979 = vsyncpa [#allocation3], 1 }
 0x7fd   :  { %1981 = vsyncpa [#allocation3 + $0x1], 1 }
 0x7fe   :  { %1982 = vsyncpa [#allocation6], 1 }
 0x7ff   :  { %1984 = vsyncpa [#allocation6 + $0x1], 1 }
 0x800   :  { %1985 = vsyncpa [#allocation9], 1 }
 0x801   :  { %1987 = vsyncpa [#allocation9 + $0x1], 1 }
 0x802   :  { %1988 = vsyncpa [#allocation4], 1 }
 0x803   :  { %1990 = vsyncpa [#allocation4 + $0x1], 1 }

</bundles_post_ra>
